<compile_context>
chip_gen: v5e
topology: v5e:2x2
jax: 0.10.0
libtpu: 0.0.40
codegen_flags: <defaults>
</compile_context>

<pallas_src>
import numpy as np
import jax
import jax.numpy as jnp
from jax.experimental import pallas as pl
from jax.experimental.pallas import tpu as pltpu

N_EMBD = 64
N_HEAD = 8
HEAD_SIZE = N_EMBD // N_HEAD
LN_EPS = 1e-5


def _block_kernel(x_ref,
                  ln1g_ref, ln1b_ref,
                  wq_ref, wk_ref, wv_ref, wproj_ref, bproj_ref,
                  ln2g_ref, ln2b_ref,
                  w1_ref, b1_ref, w2_ref, b2_ref,
                  rep_ref, col_ref, hmask_ref, nbias_ref,
                  o_ref):
    x = x_ref[...]                                           # (M, C), M = Bb*T

    # ---- LayerNorm 1 ----
    mu = jnp.mean(x, axis=-1, keepdims=True)
    var = jnp.mean(jnp.square(x - mu), axis=-1, keepdims=True)
    xln = (x - mu) * jax.lax.rsqrt(var + LN_EPS) * ln1g_ref[...] + ln1b_ref[...]

    # ---- Q/K/V projections: three small MXU matmuls, no lane slicing of a
    #      fused (M, 3C) output (64-lane slices would cross 128-lane tiles) ----
    q = jnp.dot(xln, wq_ref[...], preferred_element_type=jnp.float32)  # scale folded in Wq
    k = jnp.dot(xln, wk_ref[...], preferred_element_type=jnp.float32)
    v = jnp.dot(xln, wv_ref[...], preferred_element_type=jnp.float32)

    # ---- multi-head self-attention: all heads AND all batch entries of this
    #      block in single MXU matmuls ("block-of-heads" rows) ----
    # q_blk[h*M + r, c] = q[r, c] if channel c belongs to head h, else 0.
    # Row replication done on the MXU (rep matmul) instead of sublane copies.
    q_blk = jnp.dot(rep_ref[...], q,
                    preferred_element_type=jnp.float32) * hmask_ref[...]   # (H*M, C)

    # scores[h*M + r, r'] = q_h[r] . k_h[r']   (C**-0.5 already folded into Wq)
    s = jax.lax.dot_general(q_blk, k, (((1,), (1,)), ((), ())),
                            preferred_element_type=jnp.float32)            # (H*M, M)
    s = s + nbias_ref[...]            # -1e30 on cross-batch-entry key columns

    # Standard softmax over the key axis: the row max is the exact per-head,
    # per-query max (no shared-max underflow risk).
    m = jnp.max(s, axis=-1, keepdims=True)
    e = jnp.exp(s - m)
    p = e / jnp.sum(e, axis=-1, keepdims=True)
    # TODO(synk): attention dropout omitted (identity in eval mode).

    pv = jnp.dot(p, v, preferred_element_type=jnp.float32)                 # (H*M, C)
    # Keep only head h's channels of row block h and sum the H row blocks back.
    sa = jnp.dot(col_ref[...], pv * hmask_ref[...],
                 preferred_element_type=jnp.float32)                        # (M, C)

    sa = jnp.dot(sa, wproj_ref[...], preferred_element_type=jnp.float32) + bproj_ref[...]
    # TODO(synk): projection dropout omitted (identity in eval mode).
    x1 = x + sa                                                             # residual 1

    # ---- LayerNorm 2 ----
    mu2 = jnp.mean(x1, axis=-1, keepdims=True)
    var2 = jnp.mean(jnp.square(x1 - mu2), axis=-1, keepdims=True)
    x2n = (x1 - mu2) * jax.lax.rsqrt(var2 + LN_EPS) * ln2g_ref[...] + ln2b_ref[...]

    # ---- FeedForward: Linear(C, 4C) -> ReLU -> Linear(4C, C) ----
    h1 = jnp.dot(x2n, w1_ref[...], preferred_element_type=jnp.float32) + b1_ref[...]
    h1 = jnp.maximum(h1, 0.0)
    h2 = jnp.dot(h1, w2_ref[...], preferred_element_type=jnp.float32) + b2_ref[...]
    # TODO(synk): MLP dropout omitted (identity in eval mode).

    # TODO(synk): lane-dense (multiple-of-128) output relayout skipped — the
    # whole output is a few KB here, masked 64-lane stores are noise.
    o_ref[...] = x1 + h2                                                    # residual 2


def _attention_constants(Bb, T):
    """Compile-time attention constants (hoisted out of the kernel)."""
    C, H, hs = N_EMBD, N_HEAD, HEAD_SIZE
    M = Bb * T
    eye = np.eye(M, dtype=np.float32)
    rep = np.tile(eye, (H, 1))                    # (H*M, M): replicate query rows per head
    col = np.tile(eye, (1, H))                    # (M, H*M): sum head row-blocks back
    row_head = np.arange(H * M) // M
    col_head = np.arange(C) // hs
    hmask = (row_head[:, None] == col_head[None, :]).astype(np.float32)    # (H*M, C)
    qb = (np.arange(H * M) % M) // T              # batch entry of each query row
    kb = np.arange(M) // T                        # batch entry of each key column
    nbias = np.where(qb[:, None] == kb[None, :], 0.0, -1e30).astype(np.float32)  # (H*M, M)
    return (jnp.asarray(rep), jnp.asarray(col),
            jnp.asarray(hmask), jnp.asarray(nbias))


def block_forward(x, params, *, batch_block=None):
    B, T, C = x.shape
    assert C == N_EMBD
    (ln1g, ln1b, wq, wk, wv, wproj, bproj,
     ln2g, ln2b, w1, b1, w2, b2) = params

    # Fold the PyTorch score scale C**-0.5 into Wq.  Exact for power-of-two C
    # (64**-0.5 = 2^-3); for other C it only adds last-ulp rounding noise.
    wq_s = wq * (C ** -0.5)

    if batch_block is None:
        if B * T <= 512:
            batch_block = B           # single grid step: no per-step pipeline overhead
        else:
            # aim for ~256-512 rows per step, >=2 steps so DMA overlaps compute
            best, d = 1, 1
            while d < B and d * T <= 512:
                if B % d == 0 and B // d >= 2:
                    best = d
                d += 1
            batch_block = best
    if B % batch_block != 0:
        batch_block = 1
    Bb = batch_block
    n_steps = B // Bb
    M = Bb * T

    # VMEM guard: the block-of-heads path materializes (H*M, M) score tiles.
    attn_vmem_bytes = 4 * N_HEAD * M * (3 * M + 4 * C)
    assert attn_vmem_bytes < 24 * 1024 * 1024, (
        "TODO(synk): attention block too large for VMEM at this (Bb, T); "
        "a tiled flash-style path is needed for long sequences")

    rep, col, hmask, nbias = _attention_constants(Bb, T)

    x2d = x.reshape(B * T, C)     # free reshape; a batch entry's rows stay contiguous

    def wspec(shape):
        return pl.BlockSpec(shape, lambda i: (0, 0))   # grid-invariant block

    grid_spec = pltpu.PrefetchScalarGridSpec(
        num_scalar_prefetch=0,
        grid=(n_steps,),
        in_specs=[
            pl.BlockSpec((M, C), lambda i: (i, 0)),       # x rows for this batch block
            wspec((1, C)), wspec((1, C)),                 # ln1 gamma / beta
            wspec((C, C)), wspec((C, C)), wspec((C, C)),  # Wq (scaled), Wk, Wv
            wspec((C, C)), wspec((1, C)),                 # Wproj, bproj
            wspec((1, C)), wspec((1, C)),                 # ln2 gamma / beta
            wspec((C, 4 * C)), wspec((1, 4 * C)),         # W1, b1
            wspec((4 * C, C)), wspec((1, C)),             # W2, b2
            wspec((N_HEAD * M, M)),                       # rep
            wspec((M, N_HEAD * M)),                       # col
            wspec((N_HEAD * M, C)),                       # head-channel mask
            wspec((N_HEAD * M, M)),                       # cross-batch -1e30 bias
        ],
        out_specs=pl.BlockSpec((M, C), lambda i: (i, 0)),
    )

    # Only mark the batch axis parallel when each step carries meaningful work
    # (>=2 steps of >=128 rows); otherwise dual-TC sharding is pure overhead.
    sem = "parallel" if (n_steps >= 2 and M >= 128) else "arbitrary"

    out2d = pl.pallas_call(
        _block_kernel,
        out_shape=jax.ShapeDtypeStruct((B * T, C), jnp.float32),
        grid_spec=grid_spec,
        compiler_params=pltpu.CompilerParams(dimension_semantics=(sem,)),
    )(x2d, ln1g, ln1b, wq_s, wk, wv, wproj, bproj, ln2g, ln2b,
      w1, b1, w2, b2, rep, col, hmask, nbias)

    return out2d.reshape(B, T, C)


def init_params(key):
    C = N_EMBD
    ks = jax.random.split(key, 8)
    scale = 0.02
    ln1g = jnp.ones((1, C), jnp.float32)
    ln1b = jnp.zeros((1, C), jnp.float32)
    wq = scale * jax.random.normal(ks[0], (C, C), jnp.float32)
    wk = scale * jax.random.normal(ks[1], (C, C), jnp.float32)
    wv = scale * jax.random.normal(ks[2], (C, C), jnp.float32)
    wproj = scale * jax.random.normal(ks[3], (C, C), jnp.float32)
    bproj = scale * jax.random.normal(ks[4], (1, C), jnp.float32)
    ln2g = jnp.ones((1, C), jnp.float32)
    ln2b = jnp.zeros((1, C), jnp.float32)
    w1 = scale * jax.random.normal(ks[5], (C, 4 * C), jnp.float32)
    b1 = scale * jax.random.normal(ks[6], (1, 4 * C), jnp.float32)
    w2 = scale * jax.random.normal(ks[7], (4 * C, C), jnp.float32)
    b2 = jnp.zeros((1, C), jnp.float32)
    return (ln1g, ln1b, wq, wk, wv, wproj, bproj, ln2g, ln2b, w1, b1, w2, b2)


def block_reference(x, params):
    """Pure-JAX reference mirroring the PyTorch forward (eval mode)."""
    (ln1g, ln1b, wq, wk, wv, wproj, bproj, ln2g, ln2b, w1, b1, w2, b2) = params
    C = x.shape[-1]

    def ln(z, g, b):
        mu = jnp.mean(z, axis=-1, keepdims=True)
        var = jnp.mean((z - mu) ** 2, axis=-1, keepdims=True)
        return (z - mu) * jax.lax.rsqrt(var + LN_EPS) * g[0] + b[0]

    xln = ln(x, ln1g, ln1b)
    q = xln @ wq
    k = xln @ wk
    v = xln @ wv
    outs = []
    for h in range(N_HEAD):
        sl = slice(h * HEAD_SIZE, (h + 1) * HEAD_SIZE)
        wei = jnp.einsum("btd,bsd->bts", q[..., sl], k[..., sl]) * C ** (-0.5)
        wei = jax.nn.softmax(wei, axis=-1)
        outs.append(jnp.einsum("bts,bsd->btd", wei, v[..., sl]))
    sa = jnp.concatenate(outs, axis=-1) @ wproj + bproj[0]
    x1 = x + sa
    x2n = ln(x1, ln2g, ln2b)
    h1 = jnp.maximum(x2n @ w1 + b1[0], 0.0)
    return x1 + h1 @ w2 + b2[0]


if __name__ == "__main__":
    key = jax.random.PRNGKey(0)
    kx, kp = jax.random.split(key)

    B, T = 2, 8
    x = jax.random.normal(kx, (B, T, N_EMBD), jnp.float32)
    params = init_params(kp)

    out = block_forward(x, params)
    out = jax.block_until_ready(out)

    ref = block_reference(x, params)
    assert out.shape == (B, T, N_EMBD)
    assert jnp.allclose(out, ref, atol=1e-4, rtol=1e-4), "mismatch vs reference"

    print("KERNEL_OK")
</pallas_src>

<mosaic_0001>
module attributes {stable_mosaic.version = 11 : i64} {
  func.func @_block_kernel(%arg0: i32, %arg1: memref<16x64xf32, #tpu.memory_space<vmem>>, %arg2: memref<1x64xf32, #tpu.memory_space<vmem>>, %arg3: memref<1x64xf32, #tpu.memory_space<vmem>>, %arg4: memref<64x64xf32, #tpu.memory_space<vmem>>, %arg5: memref<64x64xf32, #tpu.memory_space<vmem>>, %arg6: memref<64x64xf32, #tpu.memory_space<vmem>>, %arg7: memref<64x64xf32, #tpu.memory_space<vmem>>, %arg8: memref<1x64xf32, #tpu.memory_space<vmem>>, %arg9: memref<1x64xf32, #tpu.memory_space<vmem>>, %arg10: memref<1x64xf32, #tpu.memory_space<vmem>>, %arg11: memref<64x256xf32, #tpu.memory_space<vmem>>, %arg12: memref<1x256xf32, #tpu.memory_space<vmem>>, %arg13: memref<256x64xf32, #tpu.memory_space<vmem>>, %arg14: memref<1x64xf32, #tpu.memory_space<vmem>>, %arg15: memref<128x16xf32, #tpu.memory_space<vmem>>, %arg16: memref<16x128xf32, #tpu.memory_space<vmem>>, %arg17: memref<128x64xf32, #tpu.memory_space<vmem>>, %arg18: memref<128x16xf32, #tpu.memory_space<vmem>>, %arg19: memref<16x64xf32, #tpu.memory_space<vmem>>) attributes {dimension_semantics = [#tpu.dimension_semantics<arbitrary>], iteration_bounds = array<i64: 1>, scalar_prefetch = 0 : i64, scratch_operands = 0 : i64, tpu.core_type = #tpu.core_type<tc>, window_params = [{transform_indices = @transform_0, window_bounds = array<i64: 16, 64>}, {pipeline_mode = #tpu.pipeline_mode<synchronous>, transform_indices = @transform_1, window_bounds = array<i64: 1, 64>}, {pipeline_mode = #tpu.pipeline_mode<synchronous>, transform_indices = @transform_2, window_bounds = array<i64: 1, 64>}, {pipeline_mode = #tpu.pipeline_mode<synchronous>, transform_indices = @transform_3, window_bounds = array<i64: 64, 64>}, {pipeline_mode = #tpu.pipeline_mode<synchronous>, transform_indices = @transform_4, window_bounds = array<i64: 64, 64>}, {pipeline_mode = #tpu.pipeline_mode<synchronous>, transform_indices = @transform_5, window_bounds = array<i64: 64, 64>}, {pipeline_mode = #tpu.pipeline_mode<synchronous>, transform_indices = @transform_6, window_bounds = array<i64: 64, 64>}, {pipeline_mode = #tpu.pipeline_mode<synchronous>, transform_indices = @transform_7, window_bounds = array<i64: 1, 64>}, {pipeline_mode = #tpu.pipeline_mode<synchronous>, transform_indices = @transform_8, window_bounds = array<i64: 1, 64>}, {pipeline_mode = #tpu.pipeline_mode<synchronous>, transform_indices = @transform_9, window_bounds = array<i64: 1, 64>}, {pipeline_mode = #tpu.pipeline_mode<synchronous>, transform_indices = @transform_10, window_bounds = array<i64: 64, 256>}, {pipeline_mode = #tpu.pipeline_mode<synchronous>, transform_indices = @transform_11, window_bounds = array<i64: 1, 256>}, {pipeline_mode = #tpu.pipeline_mode<synchronous>, transform_indices = @transform_12, window_bounds = array<i64: 256, 64>}, {pipeline_mode = #tpu.pipeline_mode<synchronous>, transform_indices = @transform_13, window_bounds = array<i64: 1, 64>}, {pipeline_mode = #tpu.pipeline_mode<synchronous>, transform_indices = @transform_14, window_bounds = array<i64: 128, 16>}, {pipeline_mode = #tpu.pipeline_mode<synchronous>, transform_indices = @transform_15, window_bounds = array<i64: 16, 128>}, {pipeline_mode = #tpu.pipeline_mode<synchronous>, transform_indices = @transform_16, window_bounds = array<i64: 128, 64>}, {pipeline_mode = #tpu.pipeline_mode<synchronous>, transform_indices = @transform_17, window_bounds = array<i64: 128, 16>}, {transform_indices = @transform_18, window_bounds = array<i64: 16, 64>}]} {
    %c0 = arith.constant 0 : index
    %c0_0 = arith.constant 0 : index
    %0 = vector.load %arg1[%c0, %c0_0] : memref<16x64xf32, #tpu.memory_space<vmem>>, vector<16x64xf32>
    %cst = arith.constant dense<0.000000e+00> : vector<16xf32>
    %1 = vector.multi_reduction <add>, %0, %cst [1] : vector<16x64xf32> to vector<16xf32>
    %2 = vector.shape_cast %1 : vector<16xf32> to vector<16x1xf32>
    %cst_1 = arith.constant 6.400000e+01 : f32
    %3 = vector.broadcast %cst_1 : f32 to vector<16x1xf32>
    %4 = arith.divf %2, %3 : vector<16x1xf32>
    %5 = vector.broadcast %4 : vector<16x1xf32> to vector<16x64xf32>
    %6 = arith.subf %0, %5 : vector<16x64xf32>
    %7 = arith.mulf %6, %6 : vector<16x64xf32>
    %cst_2 = arith.constant dense<0.000000e+00> : vector<16xf32>
    %8 = vector.multi_reduction <add>, %7, %cst_2 [1] : vector<16x64xf32> to vector<16xf32>
    %9 = vector.shape_cast %8 : vector<16xf32> to vector<16x1xf32>
    %cst_3 = arith.constant 6.400000e+01 : f32
    %10 = vector.broadcast %cst_3 : f32 to vector<16x1xf32>
    %11 = arith.divf %9, %10 : vector<16x1xf32>
    %12 = vector.broadcast %4 : vector<16x1xf32> to vector<16x64xf32>
    %13 = arith.subf %0, %12 : vector<16x64xf32>
    %cst_4 = arith.constant 9.99999974E-6 : f32
    %14 = vector.broadcast %cst_4 : f32 to vector<16x1xf32>
    %15 = arith.addf %11, %14 : vector<16x1xf32>
    %16 = math.rsqrt %15 : vector<16x1xf32>
    %17 = vector.broadcast %16 : vector<16x1xf32> to vector<16x64xf32>
    %18 = arith.mulf %13, %17 : vector<16x64xf32>
    %c0_5 = arith.constant 0 : index
    %c0_6 = arith.constant 0 : index
    %19 = vector.load %arg2[%c0_5, %c0_6] : memref<1x64xf32, #tpu.memory_space<vmem>>, vector<1x64xf32>
    %20 = vector.broadcast %19 : vector<1x64xf32> to vector<16x64xf32>
    %21 = arith.mulf %18, %20 : vector<16x64xf32>
    %c0_7 = arith.constant 0 : index
    %c0_8 = arith.constant 0 : index
    %22 = vector.load %arg3[%c0_7, %c0_8] : memref<1x64xf32, #tpu.memory_space<vmem>>, vector<1x64xf32>
    %23 = vector.broadcast %22 : vector<1x64xf32> to vector<16x64xf32>
    %24 = arith.addf %21, %23 : vector<16x64xf32>
    %c0_9 = arith.constant 0 : index
    %c0_10 = arith.constant 0 : index
    %25 = vector.load %arg4[%c0_9, %c0_10] : memref<64x64xf32, #tpu.memory_space<vmem>>, vector<64x64xf32>
    %cst_11 = arith.constant dense<0.000000e+00> : vector<16x64xf32>
    %26 = tpu.matmul %24, %25, %cst_11 {dimension_numbers = #tpu.dot_dimension_numbers<[1], [0], [0], [1], [0, 0, 1, 1], [], []>} : vector<16x64xf32>, vector<64x64xf32>, vector<16x64xf32> -> vector<16x64xf32>
    %c0_12 = arith.constant 0 : index
    %c0_13 = arith.constant 0 : index
    %27 = vector.load %arg5[%c0_12, %c0_13] : memref<64x64xf32, #tpu.memory_space<vmem>>, vector<64x64xf32>
    %cst_14 = arith.constant dense<0.000000e+00> : vector<16x64xf32>
    %28 = tpu.matmul %24, %27, %cst_14 {dimension_numbers = #tpu.dot_dimension_numbers<[1], [0], [0], [1], [0, 0, 1, 1], [], []>} : vector<16x64xf32>, vector<64x64xf32>, vector<16x64xf32> -> vector<16x64xf32>
    %c0_15 = arith.constant 0 : index
    %c0_16 = arith.constant 0 : index
    %29 = vector.load %arg6[%c0_15, %c0_16] : memref<64x64xf32, #tpu.memory_space<vmem>>, vector<64x64xf32>
    %cst_17 = arith.constant dense<0.000000e+00> : vector<16x64xf32>
    %30 = tpu.matmul %24, %29, %cst_17 {dimension_numbers = #tpu.dot_dimension_numbers<[1], [0], [0], [1], [0, 0, 1, 1], [], []>} : vector<16x64xf32>, vector<64x64xf32>, vector<16x64xf32> -> vector<16x64xf32>
    %c0_18 = arith.constant 0 : index
    %c0_19 = arith.constant 0 : index
    %31 = vector.load %arg15[%c0_18, %c0_19] : memref<128x16xf32, #tpu.memory_space<vmem>>, vector<128x16xf32>
    %cst_20 = arith.constant dense<0.000000e+00> : vector<128x64xf32>
    %32 = tpu.matmul %31, %26, %cst_20 {dimension_numbers = #tpu.dot_dimension_numbers<[1], [0], [0], [1], [0, 0, 1, 1], [], []>} : vector<128x16xf32>, vector<16x64xf32>, vector<128x64xf32> -> vector<128x64xf32>
    %c0_21 = arith.constant 0 : index
    %c0_22 = arith.constant 0 : index
    %33 = vector.load %arg17[%c0_21, %c0_22] : memref<128x64xf32, #tpu.memory_space<vmem>>, vector<128x64xf32>
    %34 = arith.mulf %32, %33 : vector<128x64xf32>
    %cst_23 = arith.constant dense<0.000000e+00> : vector<128x16xf32>
    %35 = tpu.matmul %34, %28, %cst_23 {dimension_numbers = #tpu.dot_dimension_numbers<[1], [1], [0], [0], [0, 0, 1, 0], [], []>} : vector<128x64xf32>, vector<16x64xf32>, vector<128x16xf32> -> vector<128x16xf32>
    %c0_24 = arith.constant 0 : index
    %c0_25 = arith.constant 0 : index
    %36 = vector.load %arg18[%c0_24, %c0_25] : memref<128x16xf32, #tpu.memory_space<vmem>>, vector<128x16xf32>
    %37 = arith.addf %35, %36 : vector<128x16xf32>
    %cst_26 = arith.constant dense<0xFF800000> : vector<128xf32>
    %38 = vector.multi_reduction <maximumf>, %37, %cst_26 [1] : vector<128x16xf32> to vector<128xf32>
    %39 = vector.shape_cast %38 : vector<128xf32> to vector<128x1xf32>
    %40 = vector.broadcast %39 : vector<128x1xf32> to vector<128x16xf32>
    %41 = arith.subf %37, %40 : vector<128x16xf32>
    %42 = math.exp %41 : vector<128x16xf32>
    %cst_27 = arith.constant dense<0.000000e+00> : vector<128xf32>
    %43 = vector.multi_reduction <add>, %42, %cst_27 [1] : vector<128x16xf32> to vector<128xf32>
    %44 = vector.shape_cast %43 : vector<128xf32> to vector<128x1xf32>
    %45 = vector.broadcast %44 : vector<128x1xf32> to vector<128x16xf32>
    %46 = arith.divf %42, %45 : vector<128x16xf32>
    %cst_28 = arith.constant dense<0.000000e+00> : vector<128x64xf32>
    %47 = tpu.matmul %46, %30, %cst_28 {dimension_numbers = #tpu.dot_dimension_numbers<[1], [0], [0], [1], [0, 0, 1, 1], [], []>} : vector<128x16xf32>, vector<16x64xf32>, vector<128x64xf32> -> vector<128x64xf32>
    %c0_29 = arith.constant 0 : index
    %c0_30 = arith.constant 0 : index
    %48 = vector.load %arg16[%c0_29, %c0_30] : memref<16x128xf32, #tpu.memory_space<vmem>>, vector<16x128xf32>
    %c0_31 = arith.constant 0 : index
    %c0_32 = arith.constant 0 : index
    %49 = vector.load %arg17[%c0_31, %c0_32] : memref<128x64xf32, #tpu.memory_space<vmem>>, vector<128x64xf32>
    %50 = arith.mulf %47, %49 : vector<128x64xf32>
    %cst_33 = arith.constant dense<0.000000e+00> : vector<16x64xf32>
    %51 = tpu.matmul %48, %50, %cst_33 {dimension_numbers = #tpu.dot_dimension_numbers<[1], [0], [0], [1], [0, 0, 1, 1], [], []>} : vector<16x128xf32>, vector<128x64xf32>, vector<16x64xf32> -> vector<16x64xf32>
    %c0_34 = arith.constant 0 : index
    %c0_35 = arith.constant 0 : index
    %52 = vector.load %arg7[%c0_34, %c0_35] : memref<64x64xf32, #tpu.memory_space<vmem>>, vector<64x64xf32>
    %cst_36 = arith.constant dense<0.000000e+00> : vector<16x64xf32>
    %53 = tpu.matmul %51, %52, %cst_36 {dimension_numbers = #tpu.dot_dimension_numbers<[1], [0], [0], [1], [0, 0, 1, 1], [], []>} : vector<16x64xf32>, vector<64x64xf32>, vector<16x64xf32> -> vector<16x64xf32>
    %c0_37 = arith.constant 0 : index
    %c0_38 = arith.constant 0 : index
    %54 = vector.load %arg8[%c0_37, %c0_38] : memref<1x64xf32, #tpu.memory_space<vmem>>, vector<1x64xf32>
    %55 = vector.broadcast %54 : vector<1x64xf32> to vector<16x64xf32>
    %56 = arith.addf %53, %55 : vector<16x64xf32>
    %57 = arith.addf %0, %56 : vector<16x64xf32>
    %cst_39 = arith.constant dense<0.000000e+00> : vector<16xf32>
    %58 = vector.multi_reduction <add>, %57, %cst_39 [1] : vector<16x64xf32> to vector<16xf32>
    %59 = vector.shape_cast %58 : vector<16xf32> to vector<16x1xf32>
    %cst_40 = arith.constant 6.400000e+01 : f32
    %60 = vector.broadcast %cst_40 : f32 to vector<16x1xf32>
    %61 = arith.divf %59, %60 : vector<16x1xf32>
    %62 = vector.broadcast %61 : vector<16x1xf32> to vector<16x64xf32>
    %63 = arith.subf %57, %62 : vector<16x64xf32>
    %64 = arith.mulf %63, %63 : vector<16x64xf32>
    %cst_41 = arith.constant dense<0.000000e+00> : vector<16xf32>
    %65 = vector.multi_reduction <add>, %64, %cst_41 [1] : vector<16x64xf32> to vector<16xf32>
    %66 = vector.shape_cast %65 : vector<16xf32> to vector<16x1xf32>
    %cst_42 = arith.constant 6.400000e+01 : f32
    %67 = vector.broadcast %cst_42 : f32 to vector<16x1xf32>
    %68 = arith.divf %66, %67 : vector<16x1xf32>
    %69 = vector.broadcast %61 : vector<16x1xf32> to vector<16x64xf32>
    %70 = arith.subf %57, %69 : vector<16x64xf32>
    %cst_43 = arith.constant 9.99999974E-6 : f32
    %71 = vector.broadcast %cst_43 : f32 to vector<16x1xf32>
    %72 = arith.addf %68, %71 : vector<16x1xf32>
    %73 = math.rsqrt %72 : vector<16x1xf32>
    %74 = vector.broadcast %73 : vector<16x1xf32> to vector<16x64xf32>
    %75 = arith.mulf %70, %74 : vector<16x64xf32>
    %c0_44 = arith.constant 0 : index
    %c0_45 = arith.constant 0 : index
    %76 = vector.load %arg9[%c0_44, %c0_45] : memref<1x64xf32, #tpu.memory_space<vmem>>, vector<1x64xf32>
    %77 = vector.broadcast %76 : vector<1x64xf32> to vector<16x64xf32>
    %78 = arith.mulf %75, %77 : vector<16x64xf32>
    %c0_46 = arith.constant 0 : index
    %c0_47 = arith.constant 0 : index
    %79 = vector.load %arg10[%c0_46, %c0_47] : memref<1x64xf32, #tpu.memory_space<vmem>>, vector<1x64xf32>
    %80 = vector.broadcast %79 : vector<1x64xf32> to vector<16x64xf32>
    %81 = arith.addf %78, %80 : vector<16x64xf32>
    %c0_48 = arith.constant 0 : index
    %c0_49 = arith.constant 0 : index
    %82 = vector.load %arg11[%c0_48, %c0_49] : memref<64x256xf32, #tpu.memory_space<vmem>>, vector<64x256xf32>
    %cst_50 = arith.constant dense<0.000000e+00> : vector<16x256xf32>
    %83 = tpu.matmul %81, %82, %cst_50 {dimension_numbers = #tpu.dot_dimension_numbers<[1], [0], [0], [1], [0, 0, 1, 1], [], []>} : vector<16x64xf32>, vector<64x256xf32>, vector<16x256xf32> -> vector<16x256xf32>
    %c0_51 = arith.constant 0 : index
    %c0_52 = arith.constant 0 : index
    %84 = vector.load %arg12[%c0_51, %c0_52] : memref<1x256xf32, #tpu.memory_space<vmem>>, vector<1x256xf32>
    %85 = vector.broadcast %84 : vector<1x256xf32> to vector<16x256xf32>
    %86 = arith.addf %83, %85 : vector<16x256xf32>
    %cst_53 = arith.constant 0.000000e+00 : f32
    %87 = vector.broadcast %cst_53 : f32 to vector<16x256xf32>
    %88 = arith.maximumf %86, %87 : vector<16x256xf32>
    %c0_54 = arith.constant 0 : index
    %c0_55 = arith.constant 0 : index
    %89 = vector.load %arg13[%c0_54, %c0_55] : memref<256x64xf32, #tpu.memory_space<vmem>>, vector<256x64xf32>
    %cst_56 = arith.constant dense<0.000000e+00> : vector<16x64xf32>
    %90 = tpu.matmul %88, %89, %cst_56 {dimension_numbers = #tpu.dot_dimension_numbers<[1], [0], [0], [1], [0, 0, 1, 1], [], []>} : vector<16x256xf32>, vector<256x64xf32>, vector<16x64xf32> -> vector<16x64xf32>
    %c0_57 = arith.constant 0 : index
    %c0_58 = arith.constant 0 : index
    %91 = vector.load %arg14[%c0_57, %c0_58] : memref<1x64xf32, #tpu.memory_space<vmem>>, vector<1x64xf32>
    %92 = vector.broadcast %91 : vector<1x64xf32> to vector<16x64xf32>
    %93 = arith.addf %90, %92 : vector<16x64xf32>
    %94 = arith.addf %57, %93 : vector<16x64xf32>
    %c0_59 = arith.constant 0 : index
    %c0_60 = arith.constant 0 : index
    %95 = vector.load %arg19[%c0_59, %c0_60] : memref<16x64xf32, #tpu.memory_space<vmem>>, vector<16x64xf32>
    tpu.vector_store %arg19[%c0_59, %c0_60], %94 {strides = array<i32>} : memref<16x64xf32, #tpu.memory_space<vmem>>, vector<16x64xf32>,
    return
  }
  func.func @transform_0(%arg0: i32) -> (i32, i32) {
    %c0_i32 = arith.constant 0 : i32
    %c0_i32_0 = arith.constant 0 : i32
    return %arg0, %c0_i32 : i32, i32
  }
  func.func @transform_1(%arg0: i32) -> (i32, i32) {
    %c0_i32 = arith.constant 0 : i32
    %c0_i32_0 = arith.constant 0 : i32
    %c0_i32_1 = arith.constant 0 : i32
    return %c0_i32, %c0_i32_0 : i32, i32
  }
  func.func @transform_2(%arg0: i32) -> (i32, i32) {
    %c0_i32 = arith.constant 0 : i32
    %c0_i32_0 = arith.constant 0 : i32
    %c0_i32_1 = arith.constant 0 : i32
    return %c0_i32, %c0_i32_0 : i32, i32
  }
  func.func @transform_3(%arg0: i32) -> (i32, i32) {
    %c0_i32 = arith.constant 0 : i32
    %c0_i32_0 = arith.constant 0 : i32
    %c0_i32_1 = arith.constant 0 : i32
    return %c0_i32, %c0_i32_0 : i32, i32
  }
  func.func @transform_4(%arg0: i32) -> (i32, i32) {
    %c0_i32 = arith.constant 0 : i32
    %c0_i32_0 = arith.constant 0 : i32
    %c0_i32_1 = arith.constant 0 : i32
    return %c0_i32, %c0_i32_0 : i32, i32
  }
  func.func @transform_5(%arg0: i32) -> (i32, i32) {
    %c0_i32 = arith.constant 0 : i32
    %c0_i32_0 = arith.constant 0 : i32
    %c0_i32_1 = arith.constant 0 : i32
    return %c0_i32, %c0_i32_0 : i32, i32
  }
  func.func @transform_6(%arg0: i32) -> (i32, i32) {
    %c0_i32 = arith.constant 0 : i32
    %c0_i32_0 = arith.constant 0 : i32
    %c0_i32_1 = arith.constant 0 : i32
    return %c0_i32, %c0_i32_0 : i32, i32
  }
  func.func @transform_7(%arg0: i32) -> (i32, i32) {
    %c0_i32 = arith.constant 0 : i32
    %c0_i32_0 = arith.constant 0 : i32
    %c0_i32_1 = arith.constant 0 : i32
    return %c0_i32, %c0_i32_0 : i32, i32
  }
  func.func @transform_8(%arg0: i32) -> (i32, i32) {
    %c0_i32 = arith.constant 0 : i32
    %c0_i32_0 = arith.constant 0 : i32
    %c0_i32_1 = arith.constant 0 : i32
    return %c0_i32, %c0_i32_0 : i32, i32
  }
  func.func @transform_9(%arg0: i32) -> (i32, i32) {
    %c0_i32 = arith.constant 0 : i32
    %c0_i32_0 = arith.constant 0 : i32
    %c0_i32_1 = arith.constant 0 : i32
    return %c0_i32, %c0_i32_0 : i32, i32
  }
  func.func @transform_10(%arg0: i32) -> (i32, i32) {
    %c0_i32 = arith.constant 0 : i32
    %c0_i32_0 = arith.constant 0 : i32
    %c0_i32_1 = arith.constant 0 : i32
    return %c0_i32, %c0_i32_0 : i32, i32
  }
  func.func @transform_11(%arg0: i32) -> (i32, i32) {
    %c0_i32 = arith.constant 0 : i32
    %c0_i32_0 = arith.constant 0 : i32
    %c0_i32_1 = arith.constant 0 : i32
    return %c0_i32, %c0_i32_0 : i32, i32
  }
  func.func @transform_12(%arg0: i32) -> (i32, i32) {
    %c0_i32 = arith.constant 0 : i32
    %c0_i32_0 = arith.constant 0 : i32
    %c0_i32_1 = arith.constant 0 : i32
    return %c0_i32, %c0_i32_0 : i32, i32
  }
  func.func @transform_13(%arg0: i32) -> (i32, i32) {
    %c0_i32 = arith.constant 0 : i32
    %c0_i32_0 = arith.constant 0 : i32
    %c0_i32_1 = arith.constant 0 : i32
    return %c0_i32, %c0_i32_0 : i32, i32
  }
  func.func @transform_14(%arg0: i32) -> (i32, i32) {
    %c0_i32 = arith.constant 0 : i32
    %c0_i32_0 = arith.constant 0 : i32
    %c0_i32_1 = arith.constant 0 : i32
    return %c0_i32, %c0_i32_0 : i32, i32
  }
  func.func @transform_15(%arg0: i32) -> (i32, i32) {
    %c0_i32 = arith.constant 0 : i32
    %c0_i32_0 = arith.constant 0 : i32
    %c0_i32_1 = arith.constant 0 : i32
    return %c0_i32, %c0_i32_0 : i32, i32
  }
  func.func @transform_16(%arg0: i32) -> (i32, i32) {
    %c0_i32 = arith.constant 0 : i32
    %c0_i32_0 = arith.constant 0 : i32
    %c0_i32_1 = arith.constant 0 : i32
    return %c0_i32, %c0_i32_0 : i32, i32
  }
  func.func @transform_17(%arg0: i32) -> (i32, i32) {
    %c0_i32 = arith.constant 0 : i32
    %c0_i32_0 = arith.constant 0 : i32
    %c0_i32_1 = arith.constant 0 : i32
    return %c0_i32, %c0_i32_0 : i32, i32
  }
  func.func @transform_18(%arg0: i32) -> (i32, i32) {
    %c0_i32 = arith.constant 0 : i32
    %c0_i32_0 = arith.constant 0 : i32
    return %arg0, %c0_i32 : i32, i32
  }
}

</mosaic_0001>

<bundles_post_ra>
// kernel: tpu_custom_call.1
= control target key start
LH: loop header
LB: loop body
LE: loop exit
PB: predicated region body
PF: predicated region fallthrough
CT: control target
= control target key end

     0   :  { %s2359_s0 = inlined_call_operand.vmem [shape: f32[16,64], index: 0, kind: input, shape index: {}]   ;;  %s2360_s1 = inlined_call_operand.vmem [shape: f32[1,64], index: 1, kind: input, shape index: {}]   ;;  %s2361_s2 = inlined_call_operand.vmem [shape: f32[1,64], index: 2, kind: input, shape index: {}]   ;;  %s2362_s3 = inlined_call_operand.vmem [shape: f32[64,64], index: 3, kind: input, shape index: {}]   ;;  %s2363_s4 = inlined_call_operand.vmem [shape: f32[64,64], index: 4, kind: input, shape index: {}]   ;;  %s2364_s5 = inlined_call_operand.vmem [shape: f32[64,64], index: 5, kind: input, shape index: {}]   ;;  %s2365_s6 = inlined_call_operand.vmem [shape: f32[64,64], index: 6, kind: input, shape index: {}]   ;;  %s2366_s7 = inlined_call_operand.vmem [shape: f32[1,64], index: 7, kind: input, shape index: {}]   ;;  %s2367_s8 = inlined_call_operand.vmem [shape: f32[1,64], index: 8, kind: input, shape index: {}]   ;;  %s2368_s9 = inlined_call_operand.vmem [shape: f32[1,64], index: 9, kind: input, shape index: {}]   ;;  %s2369_s10 = inlined_call_operand.vmem [shape: f32[64,256], index: 10, kind: input, shape index: {}]   ;;  %s2370_s11 = inlined_call_operand.vmem [shape: f32[1,256], index: 11, kind: input, shape index: {}]   ;;  %s2371_s12 = inlined_call_operand.vmem [shape: f32[256,64], index: 12, kind: input, shape index: {}]   ;;  %s2372_s13 = inlined_call_operand.vmem [shape: f32[1,64], index: 13, kind: input, shape index: {}]   ;;  %s2373_s14 = inlined_call_operand.vmem [shape: f32[128,16], index: 14, kind: input, shape index: {}]   ;;  %s2374_s15 = inlined_call_operand.vmem [shape: f32[16,128], index: 15, kind: input, shape index: {}]   ;;  %s2375_s16 = inlined_call_operand.vmem [shape: f32[128,64], index: 16, kind: input, shape index: {}]   ;;  %s2376_s17 = inlined_call_operand.vmem [shape: f32[128,16], index: 17, kind: input, shape index: {}]   ;;  %s2377_s18 = inlined_call_operand.hbm [shape: f32[16,64], index: 18, kind: output, shape index: {}]  }
   0x1   :  { %2379 = sst [smem:[#allocation5_spill]] %s2359_s0 }
   0x2   :  { %2380 = sst [smem:[#allocation6_spill]] %s2360_s1 }
   0x3   :  { %2381 = sst [smem:[#allocation7_spill]] %s2361_s2 }
   0x4   :  { %s2382_s29 = sld [smem:[#allocation5_spill]]  ;;  %vm62_vm0 = vcmask 523264  }
   0xa   :  { %v60_v0 = vld [vmem:[%s2382_s29] sm:$0xff] }
   0xb   :  { %v63_v1 = vsel %vm62_vm0, %v60_v0, 0.0 }
   0xc   :  { %64 = vadd.xlane.f32.xlu0 %v63_v1 }
   0xd   :  { %23 = vsyncpa [#allocation3], 0  ;;  %v61_v2 = vld [vmem:[%s2382_s29 + $0x8] sm:$0xff]  ;;  %v1528_v4 = vmov 64.0   ;;  %v133_v21 = vld [vmem:[%s2362_s3 + $0x38] sm:$0xff]  ;;  %s2384_s25 = sld [smem:[#allocation7_spill]] }
   0xe   :  { %v66_v3 = vsel %vm62_vm0, %v61_v2, 0.0  ;;  %1413 = vrcp.f32 %v1528_v4  ;;  %v170_v22 = vld [vmem:[%s2363_s4 + $0x38] sm:$0xff]  ;;  %148 = vmatpush.msra.mxu0 %v133_v21  ;;  %v132_v24 = vld [vmem:[%s2362_s3 + $0x30] sm:$0xff]  ;;  %v131_v27 = vld [vmem:[%s2362_s3 + $0x28] sm:$0xff]  ;;  %vm241_vm8 = vcmask 130048   ;;  %s1529_s24 = smov [#allocation2]  }
   0xf   :  { %v201_v23 = vld [vmem:[%s2364_s5 + $0x38] sm:$0xff]  ;;  %179 = vmatpush.msra.mxu1 %v170_v22  ;;  %v169_v25 = vld [vmem:[%s2363_s4 + $0x30] sm:$0xff]  ;;  %v168_v28 = vld [vmem:[%s2363_s4 + $0x28] sm:$0xff]  ;;  %s1531_s26 = smov 8  }
  0x10   :  { %210 = vmatpush.msra.mxu2 %v201_v23  ;;  %v200_v26 = vld [vmem:[%s2364_s5 + $0x30] sm:$0xff]  ;;  %149 = vmatpush.msra.mxu0 %v132_v24  ;;  %v199_v29 = vld [vmem:[%s2364_s5 + $0x28] sm:$0xff]  ;;  %v130_v30 = vld [vmem:[%s2362_s3 + $0x20] sm:$0xff] }
  0x11   :  { %180 = vmatpush.msra.mxu1 %v169_v25  ;;  %v167_v31 = vld [vmem:[%s2363_s4 + $0x20] sm:$0xff]  ;;  %v129_v33 = vld [vmem:[%s2362_s3 + $0x18] sm:$0xff]  ;;  %v128_v36 = vld [vmem:[%s2362_s3 + $0x10] sm:$0xff] }
  0x12   :  { %211 = vmatpush.msra.mxu2 %v200_v26  ;;  %150 = vmatpush.msra.mxu0 %v131_v27  ;;  %v198_v32 = vld [vmem:[%s2364_s5 + $0x20] sm:$0xff]  ;;  %v166_v34 = vld [vmem:[%s2363_s4 + $0x18] sm:$0xff]  ;;  %v165_v37 = vld [vmem:[%s2363_s4 + $0x10] sm:$0xff] }
  0x13   :  { %181 = vmatpush.msra.mxu1 %v168_v28  ;;  %v197_v35 = vld [vmem:[%s2364_s5 + $0x18] sm:$0xff]  ;;  %v196_v38 = vld [vmem:[%s2364_s5 + $0x10] sm:$0xff]  ;;  %v127_v39 = vld [vmem:[%s2362_s3 + $0x8] sm:$0xff] }
  0x14   :  { %67 = vadd.xlane.f32.xlu0 %v66_v3  ;;  %v1414_v5 = vpop.eup %1413  ;;  %212 = vmatpush.msra.mxu2 %v199_v29  ;;  %v164_v40 = vld [vmem:[%s2363_s4 + $0x8] sm:$0xff]  ;;  %v126_v42 = vld [vmem:[%s2362_s3] sm:$0xff]  ;;  %v231_v22 = vld [vmem:[%s2373_s14 + $0x30] sm:$0xff] }
  0x15   :  { %v70_v6 = vmul.f32 64.0, %v1414_v5  ;;  %vm74_vm1 = vweird.f32 %v1414_v5  ;;  %151 = vmatpush.msra.mxu0 %v130_v30  ;;  %182 = vmatpush.msra.mxu1 %v167_v31  ;;  %v195_v41 = vld [vmem:[%s2364_s5 + $0x8] sm:$0xff]  ;;  %v163_v43 = vld [vmem:[%s2363_s4] sm:$0xff]  ;;  %v232_v23 = vld [vmem:[%s2373_s14 + $0x38] sm:$0xff] }
  0x16   :  { %213 = vmatpush.msra.mxu2 %v198_v32  ;;  %v194_v44 = vld [vmem:[%s2364_s5] sm:$0xff]  ;;  %s2383_s5 = sld [smem:[#allocation6_spill]]  ;;  %v230_v21 = vld [vmem:[%s2373_s14 + $0x28] sm:$0xff]  ;;  %v235_v26 = vld [vmem:[%s2373_s14 + $0x50] sm:$0xff] }
  0x17   :  { %v71_v7 = vsub.f32 1.0, %v70_v6  ;;  %152 = vmatpush.msra.mxu0 %v129_v33  ;;  %183 = vmatpush.msra.mxu1 %v166_v34  ;;  %v1408_v63 = vld [vmem:[%s2384_s25] ss:$0 sm:$0xff]  ;;  %v234_v25 = vld [vmem:[%s2373_s14 + $0x48] sm:$0xff]  ;;  %v236_v27 = vld [vmem:[%s2373_s14 + $0x58] sm:$0xff] }
  0x18   :  { %214 = vmatpush.msra.mxu2 %v197_v35  ;;  %v233_v24 = vld [vmem:[%s2373_s14 + $0x40] sm:$0xff]  ;;  %v356_v32 = vld [vmem:[%s2375_s16 + $0x8] sm:$0xff] }
  0x19   :  { %v72_v8 = vmul.f32 %v1414_v5, %v71_v7  ;;  %153 = vmatpush.msra.mxu0 %v128_v36  ;;  %184 = vmatpush.msra.mxu1 %v165_v37  ;;  %v355_v28 = vld [vmem:[%s2375_s16] sm:$0xff]  ;;  %v238_v35 = vld [vmem:[%s2373_s14 + $0x68] sm:$0xff]  ;;  %v357_v36 = vld [vmem:[%s2375_s16 + $0x10] sm:$0xff] }
  0x1a   :  { %215 = vmatpush.msra.mxu2 %v196_v38  ;;  %v237_v31 = vld [vmem:[%s2373_s14 + $0x60] sm:$0xff] }
  0x1b   :  { %v73_v9 = vadd.f32 %v1414_v5, %v72_v8  ;;  %154 = vmatpush.msra.mxu0 %v127_v39  ;;  %185 = vmatpush.msra.mxu1 %v164_v40  ;;  %v239_v39 = vld [vmem:[%s2373_s14 + $0x70] sm:$0xff]  ;;  %v358_v40 = vld [vmem:[%s2375_s16 + $0x18] sm:$0xff] }
  0x1c   :  { %216 = vmatpush.msra.mxu2 %v195_v41  ;;  %v1407_v59 = vld [vmem:[%s2383_s5] ss:$0 sm:$0xff] }
  0x1d   :  { %v1635_v10 = vsel %vm74_vm1, %v1414_v5, %v73_v9  ;;  %155 = vmatpush.msra.mxu0 %v126_v42  ;;  %186 = vmatpush.msra.mxu1 %v163_v43  ;;  %v240_v43 = vld [vmem:[%s2373_s14 + $0x78] sm:$0xff] }
  0x1e   :  { %217 = vmatpush.msra.mxu2 %v194_v44  ;;  %v359_v44 = vld [vmem:[%s2375_s16 + $0x20] sm:$0xff] }
  0x7f   :  { %v65_v11 = vpop.xlane.xlu0 %64 }
  0x80   :  { %v76_v12 = vmul.f32 %v1635_v10, %v65_v11 }
  0x82   :  { %v1638_v13 = vsub.f32 %v60_v0, %v76_v12 }
  0x84   :  { %v80_v14 = vmul.f32 %v1638_v13, %v1638_v13 }
  0x86   :  { %v82_v15 = vsel %vm62_vm0, %v80_v14, 0.0 }
  0x87   :  { %83 = vadd.xlane.f32.xlu1 %v82_v15  ;;  %v68_v16 = vpop.xlane.xlu0 %67  ;;  %v225_v15 = vld [vmem:[%s2373_s14] sm:$0xff] }
  0x88   :  { %v77_v17 = vmul.f32 %v1635_v10, %v68_v16 }
  0x8a   :  { %v1644_v18 = vsub.f32 %v61_v2, %v77_v17  ;;  %v226_v17 = vld [vmem:[%s2373_s14 + $0x8] sm:$0xff] }
  0x8c   :  { %v81_v19 = vmul.f32 %v1644_v18, %v1644_v18 }
  0x8e   :  { %v85_v20 = vsel %vm62_vm0, %v81_v19, 0.0  ;;  %v228_v19 = vld [vmem:[%s2373_s14 + $0x18] sm:$0xff] }
  0x8f   :  { %86 = vadd.xlane.f32.xlu1 %v85_v20  ;;  %v229_v20 = vld [vmem:[%s2373_s14 + $0x20] sm:$0xff] }
  0xfa   :  { %v84_v45 = vpop.xlane.xlu1 %83 }
  0xfb   :  { %v88_v46 = vmul.f32 %v84_v45, %v1635_v10 }
  0xfd   :  { %v90_v47 = vadd.f32 1e-05, %v88_v46 }
  0xff   :  { %1415 = vrsqrt.f32 %v90_v47  ;;  %vm98_vm3 = vweird.f32 %v90_v47 }
 0x102   :  { %v87_v48 = vpop.xlane.xlu1 %86 }
 0x103   :  { %v89_v49 = vmul.f32 %v87_v48, %v1635_v10 }
 0x105   :  { %v1416_v50 = vpop.eup %1415  ;;  %v91_v51 = vadd.f32 1e-05, %v89_v49 }
 0x106   :  { %v93_v52 = vmul.f32 %v1416_v50, %v90_v47  ;;  %vm99_vm2 = vweird.f32 %v1416_v50  ;;  %v360_v47 = vld [vmem:[%s2375_s16 + $0x28] sm:$0xff] }
 0x107   :  { %1417 = vrsqrt.f32 %v91_v51  ;;  %vm100_vm4 = vmor %vm98_vm3, %vm99_vm2  ;;  %vm108_vm6 = vweird.f32 %v91_v51 }
 0x108   :  { %v94_v53 = vmul.f32 %v1416_v50, %v93_v52 }
 0x10a   :  { %v95_v54 = vmul.f32 0.5, %v94_v53  ;;  %v362_v53 = vld [vmem:[%s2375_s16 + $0x38] sm:$0xff] }
 0x10c   :  { %v96_v55 = vsub.f32 1.5, %v95_v54 }
 0x10d   :  { %v1418_v56 = vpop.eup %1417 }
 0x10e   :  { %v97_v57 = vmul.f32 %v1416_v50, %v96_v55  ;;  %v103_v58 = vmul.f32 %v1418_v56, %v91_v51  ;;  %vm109_vm5 = vweird.f32 %v1418_v56 }
 0x10f   :  { %vm110_vm7 = vmor %vm108_vm6, %vm109_vm5 }
 0x110   :  { %v101_v60 = vsel %vm100_vm4, %v1416_v50, %v97_v57  ;;  %v104_v61 = vmul.f32 %v1418_v56, %v103_v58  ;;  %v361_v50 = vld [vmem:[%s2375_s16 + $0x30] sm:$0xff] }
 0x111   :  { %v112_v62 = vmul.f32 %v101_v60, %v1638_v13 }
 0x112   :  { %v105_v0 = vmul.f32 0.5, %v104_v61 }
 0x113   :  { %v118_v1 = vmul.f32 %v1407_v59, %v112_v62  ;;  %v365_v62 = vld [vmem:[%s2375_s16 + $0x50] sm:$0xff] }
 0x114   :  { %v106_v2 = vsub.f32 1.5, %v105_v0 }
 0x115   :  { %v124_v3 = vadd.f32 %v1408_v63, %v118_v1  ;;  %v366_v1 = vld [vmem:[%s2375_s16 + $0x58] sm:$0xff] }
 0x116   :  { %v107_v4 = vmul.f32 %v1418_v56, %v106_v2  ;;  %v387_v2 = vld [vmem:[%s2376_s17] sm:$0xff] }
 0x117   :  { %1341 = vmatmul.msk.f32.vlgmr.msra.gmra.mxu0 %vm62_vm0, %v124_v3  ;;  %1343 = vmatmul.msk.f32.vlgmr.msra.gmra.mxu1 %vm62_vm0, %v124_v3 }
 0x118   :  { %v111_v5 = vsel %vm110_vm7, %v1418_v56, %v107_v4  ;;  %1345 = vmatmul.msk.f32.vlgmr.msra.gmra.mxu2 %vm62_vm0, %v124_v3  ;;  %v363_v56 = vld [vmem:[%s2375_s16 + $0x40] sm:$0xff] }
 0x119   :  { %v113_v6 = vmul.f32 %v111_v5, %v1644_v18  ;;  %v227_v18 = vld [vmem:[%s2373_s14 + $0x10] sm:$0xff] }
 0x11b   :  { %v119_v7 = vmul.f32 %v1407_v59, %v113_v6  ;;  %v364_v59 = vld [vmem:[%s2375_s16 + $0x48] sm:$0xff] }
 0x11d   :  { %v125_v8 = vadd.f32 %v1408_v63, %v119_v7 }
 0x11f   :  { %1342 = vmatmul.msk.f32.gmra.mxu0 %vm62_vm0, %v125_v8  ;;  %1344 = vmatmul.msk.f32.gmra.mxu1 %vm62_vm0, %v125_v8 }
 0x120   :  { %1346 = vmatmul.msk.f32.gmra.mxu2 %vm62_vm0, %v125_v8  ;;  %v367_v8 = vld [vmem:[%s2375_s16 + $0x60] sm:$0xff] }
 0x194   :  { %v157_v9 = vpop.f32.mrf.mxu0  ;;  %v188_v11 = vpop.f32.mrf.mxu1 }
 0x19b   :  { %v219_v12 = vpop.f32.mrf.mxu2 }
 0x19c   :  { %v160_v13 = vpop.f32.mrf.mxu0  ;;  %v191_v14 = vpop.f32.mrf.mxu1 }
 0x19d   :  { %304 = vmatpush.msra.mxu3 %v160_v13  ;;  %1363 = vmatpush.xpose.msk.msrb.mxu0 %vm62_vm0, %v191_v14 }
 0x19f   :  { %305 = vmatpush.msra.mxu3 %v157_v9  ;;  %v388_v9 = vld [vmem:[%s2376_s17 + $0x8] sm:$0xff] }
 0x1a0   :  { %1347 = vmatmul.msk.f32.vlgmr.msra.gmra.mxu3 %vm241_vm8, %v225_v15 }
 0x1a1   :  { %1364 = vmatpush.xpose.msk.msrb.mxu0 %vm62_vm0, %v188_v11 }
 0x1a3   :  { %v222_v16 = vpop.f32.mrf.mxu2 }
 0x1a4   :  { %968 = vmatpush.msrb.mxu1 %v222_v16  ;;  %v1866_v16 = vld [vmem:[%s2375_s16 + $0x68] sm:$0xff] }
 0x1a6   :  { %969 = vmatpush.msrb.mxu1 %v219_v12 }
 0x1a8   :  { %1348 = vmatmul.msk.f32.gmra.mxu3 %vm241_vm8, %v226_v17  ;;  %v389_v17 = vld [vmem:[%s2376_s17 + $0x10] sm:$0xff] }
 0x1b0   :  { %1349 = vmatmul.msk.f32.gmra.mxu3 %vm241_vm8, %v227_v18 }
 0x1b8   :  { %1350 = vmatmul.msk.f32.gmra.mxu3 %vm241_vm8, %v228_v19 }
 0x1c0   :  { %1351 = vmatmul.msk.f32.gmra.mxu3 %vm241_vm8, %v229_v20 }
 0x1c8   :  { %1352 = vmatmul.msk.f32.gmra.mxu3 %vm241_vm8, %v230_v21 }
 0x1d0   :  { %1353 = vmatmul.msk.f32.gmra.mxu3 %vm241_vm8, %v231_v22 }
 0x1d8   :  { %1354 = vmatmul.msk.f32.gmra.mxu3 %vm241_vm8, %v232_v23  ;;  %v1877_v23 = vld [vmem:[%s2375_s16 + $0x70] sm:$0xff] }
 0x1e0   :  { %1355 = vmatmul.msk.f32.gmra.mxu3 %vm241_vm8, %v233_v24  ;;  %v390_v24 = vld [vmem:[%s2376_s17 + $0x18] sm:$0xff] }
 0x1e8   :  { %1356 = vmatmul.msk.f32.gmra.mxu3 %vm241_vm8, %v234_v25 }
 0x1f0   :  { %1357 = vmatmul.msk.f32.gmra.mxu3 %vm241_vm8, %v235_v26 }
 0x1f8   :  { %1358 = vmatmul.msk.f32.gmra.mxu3 %vm241_vm8, %v236_v27 }
 0x200   :  { %1359 = vmatmul.msk.f32.gmra.mxu3 %vm241_vm8, %v237_v31  ;;  %v391_v31 = vld [vmem:[%s2376_s17 + $0x20] sm:$0xff] }
 0x208   :  { %1360 = vmatmul.msk.f32.gmra.mxu3 %vm241_vm8, %v238_v35 }
 0x210   :  { %1361 = vmatmul.msk.f32.gmra.mxu3 %vm241_vm8, %v239_v39 }
 0x218   :  { %1362 = vmatmul.msk.f32.gmra.mxu3 %vm241_vm8, %v240_v43 }
 0x223   :  { %v307_v29 = vpop.f32.mrf.mxu3 }
 0x224   :  { %v371_v30 = vmul.f32 %v355_v28, %v307_v29 }
 0x226   :  { %1365 = vmatmul.msk.f32.vlgmr.msrb.gmra.mxu0 %vm62_vm0, %v371_v30  ;;  %v1888_v30 = vld [vmem:[%s2375_s16 + $0x78] sm:$0xff] }
 0x22b   :  { %v310_v33 = vpop.f32.mrf.mxu3 }
 0x22c   :  { %v372_v34 = vmul.f32 %v356_v32, %v310_v33 }
 0x22e   :  { %1366 = vmatmul.msk.f32.gmra.mxu0 %vm62_vm0, %v372_v34 }
 0x233   :  { %v313_v37 = vpop.f32.mrf.mxu3 }
 0x234   :  { %v373_v38 = vmul.f32 %v357_v36, %v313_v37  ;;  %v392_v37 = vld [vmem:[%s2376_s17 + $0x28] sm:$0xff] }
 0x236   :  { %1367 = vmatmul.msk.f32.gmra.mxu0 %vm62_vm0, %v373_v38 }
 0x23b   :  { %v316_v41 = vpop.f32.mrf.mxu3 }
 0x23c   :  { %v374_v42 = vmul.f32 %v358_v40, %v316_v41  ;;  %v393_v41 = vld [vmem:[%s2376_s17 + $0x30] sm:$0xff] }
 0x23e   :  { %1368 = vmatmul.msk.f32.gmra.mxu0 %vm62_vm0, %v374_v42 }
 0x243   :  { %v319_v45 = vpop.f32.mrf.mxu3 }
 0x244   :  { %v375_v46 = vmul.f32 %v359_v44, %v319_v45  ;;  %v394_v45 = vld [vmem:[%s2376_s17 + $0x38] sm:$0xff] }
 0x246   :  { %1369 = vmatmul.msk.f32.gmra.mxu0 %vm62_vm0, %v375_v46 }
 0x24b   :  { %v322_v48 = vpop.f32.mrf.mxu3 }
 0x24c   :  { %v376_v49 = vmul.f32 %v360_v47, %v322_v48 }
 0x24e   :  { %1370 = vmatmul.msk.f32.gmra.mxu0 %vm62_vm0, %v376_v49 }
 0x253   :  { %v325_v51 = vpop.f32.mrf.mxu3 }
 0x254   :  { %v377_v52 = vmul.f32 %v361_v50, %v325_v51 }
 0x256   :  { %1371 = vmatmul.msk.f32.gmra.mxu0 %vm62_vm0, %v377_v52 }
 0x25b   :  { %v328_v54 = vpop.f32.mrf.mxu3 }
 0x25c   :  { %v378_v55 = vmul.f32 %v362_v53, %v328_v54 }
 0x25e   :  { %1372 = vmatmul.msk.f32.gmra.mxu0 %vm62_vm0, %v378_v55 }
 0x263   :  { %v331_v57 = vpop.f32.mrf.mxu3 }
 0x264   :  { %v379_v58 = vmul.f32 %v363_v56, %v331_v57 }
 0x266   :  { %1373 = vmatmul.msk.f32.gmra.mxu0 %vm62_vm0, %v379_v58  ;;  %v395_v58 = vld [vmem:[%s2376_s17 + $0x40] sm:$0xff] }
 0x26b   :  { %v334_v60 = vpop.f32.mrf.mxu3 }
 0x26c   :  { %v380_v61 = vmul.f32 %v364_v59, %v334_v60 }
 0x26e   :  { %1374 = vmatmul.msk.f32.gmra.mxu0 %vm62_vm0, %v380_v61 }
 0x273   :  { %v337_v63 = vpop.f32.mrf.mxu3 }
 0x274   :  { %v381_v0 = vmul.f32 %v365_v62, %v337_v63 }
 0x276   :  { %1375 = vmatmul.msk.f32.gmra.mxu0 %vm62_vm0, %v381_v0 }
 0x27b   :  { %v340_v3 = vpop.f32.mrf.mxu3 }
 0x27c   :  { %v382_v5 = vmul.f32 %v366_v1, %v340_v3  ;;  %v396_v3 = vld [vmem:[%s2376_s17 + $0x48] sm:$0xff] }
 0x27e   :  { %1376 = vmatmul.msk.f32.gmra.mxu0 %vm62_vm0, %v382_v5 }
 0x283   :  { %v343_v11 = vpop.f32.mrf.mxu3 }
 0x284   :  { %v383_v13 = vmul.f32 %v367_v8, %v343_v11 }
 0x286   :  { %1377 = vmatmul.msk.f32.gmra.mxu0 %vm62_vm0, %v383_v13 }
 0x28b   :  { %v346_v18 = vpop.f32.mrf.mxu3 }
 0x28c   :  { %v384_v20 = vmul.f32 %v1866_v16, %v346_v18 }
 0x28e   :  { %1378 = vmatmul.msk.f32.gmra.mxu0 %vm62_vm0, %v384_v20 }
 0x293   :  { %v349_v25 = vpop.f32.mrf.mxu3 }
 0x294   :  { %v385_v27 = vmul.f32 %v1877_v23, %v349_v25 }
 0x296   :  { %1379 = vmatmul.msk.f32.gmra.mxu0 %vm62_vm0, %v385_v27 }
 0x29b   :  { %v352_v32 = vpop.f32.mrf.mxu3 }
 0x29c   :  { %v386_v34 = vmul.f32 %v1888_v30, %v352_v32 }
 0x29e   :  { %1380 = vmatmul.msk.f32.gmra.mxu0 %vm62_vm0, %v386_v34 }
 0x2a3   :  { %v474_v4 = vpop.f32.mrf.mxu0 }
 0x2a4   :  { %v475_v6 = vadd.f32 %v474_v4, %v387_v2 }
 0x2a6   :  { %v522_v7 = vsel %vm241_vm8, %v475_v6, -inf }
 0x2a7   :  { %523 = vmax.xlane.f32.xlu2 %v522_v7 }
 0x2ab   :  { %v477_v12 = vpop.f32.mrf.mxu0 }
 0x2ac   :  { %v478_v14 = vadd.f32 %v477_v12, %v388_v9  ;;  %v397_v12 = vld [vmem:[%s2376_s17 + $0x50] sm:$0xff] }
 0x2ae   :  { %v525_v15 = vsel %vm241_vm8, %v478_v14, -inf }
 0x2af   :  { %526 = vmax.xlane.f32.xlu2 %v525_v15 }
 0x2b3   :  { %v480_v19 = vpop.f32.mrf.mxu0 }
 0x2b4   :  { %v481_v21 = vadd.f32 %v480_v19, %v389_v17 }
 0x2b6   :  { %v528_v22 = vsel %vm241_vm8, %v481_v21, -inf }
 0x2b7   :  { %529 = vmax.xlane.f32.xlu0 %v528_v22  ;;  %v398_v22 = vld [vmem:[%s2376_s17 + $0x58] sm:$0xff] }
 0x2bb   :  { %v483_v26 = vpop.f32.mrf.mxu0 }
 0x2bc   :  { %v484_v28 = vadd.f32 %v483_v26, %v390_v24 }
 0x2be   :  { %v531_v29 = vsel %vm241_vm8, %v484_v28, -inf }
 0x2bf   :  { %532 = vmax.xlane.f32.xlu1 %v531_v29 }
 0x2c3   :  { %v486_v33 = vpop.f32.mrf.mxu0 }
 0x2c4   :  { %v487_v35 = vadd.f32 %v486_v33, %v391_v31  ;;  %v399_v33 = vld [vmem:[%s2376_s17 + $0x60] sm:$0xff] }
 0x2c6   :  { %v534_v36 = vsel %vm241_vm8, %v487_v35, -inf }
 0x2c7   :  { %535 = vmax.xlane.f32.xlu2 %v534_v36 }
 0x2cb   :  { %v489_v38 = vpop.f32.mrf.mxu0 }
 0x2cc   :  { %v1899_v39 = vadd.f32 %v489_v38, %v392_v37 }
 0x2ce   :  { %v537_v40 = vsel %vm241_vm8, %v1899_v39, -inf }
 0x2cf   :  { %538 = vmax.xlane.f32.xlu0 %v537_v40 }
 0x2d3   :  { %v492_v42 = vpop.f32.mrf.mxu0 }
 0x2d4   :  { %v1906_v43 = vadd.f32 %v492_v42, %v393_v41  ;;  %v400_v42 = vld [vmem:[%s2376_s17 + $0x68] sm:$0xff] }
 0x2d6   :  { %v540_v44 = vsel %vm241_vm8, %v1906_v43, -inf }
 0x2d7   :  { %541 = vmax.xlane.f32.xlu1 %v540_v44 }
 0x2db   :  { %v495_v46 = vpop.f32.mrf.mxu0 }
 0x2dc   :  { %v1913_v47 = vadd.f32 %v495_v46, %v394_v45 }
 0x2de   :  { %v543_v48 = vsel %vm241_vm8, %v1913_v47, -inf }
 0x2df   :  { %544 = vmax.xlane.f32.xlu0 %v543_v48 }
 0x2e3   :  { %v498_v49 = vpop.f32.mrf.mxu0 }
 0x2e4   :  { %v1924_v60 = vadd.f32 %v498_v49, %v395_v58 }
 0x2e6   :  { %v546_v0 = vsel %vm241_vm8, %v1924_v60, -inf }
 0x2eb   :  { %v501_v53 = vpop.f32.mrf.mxu0 }
 0x2ec   :  { %v1935_v5 = vadd.f32 %v501_v53, %v396_v3 }
 0x2ee   :  { %v549_v8 = vsel %vm241_vm8, %v1935_v5, -inf }
 0x2f3   :  { %v504_v63 = vpop.f32.mrf.mxu0 }
 0x2f4   :  { %v1946_v15 = vadd.f32 %v504_v63, %v397_v12 }
 0x2f6   :  { %v552_v19 = vsel %vm241_vm8, %v1946_v15, -inf }
 0x2fb   :  { %v507_v13 = vpop.f32.mrf.mxu0 }
 0x2fc   :  { %v1957_v26 = vadd.f32 %v507_v13, %v398_v22 }
 0x2fe   :  { %v555_v29 = vsel %vm241_vm8, %v1957_v26, -inf }
 0x303   :  { %v510_v25 = vpop.f32.mrf.mxu0 }
 0x30b   :  { %v513_v36 = vpop.f32.mrf.mxu0 }
 0x30c   :  { %v1981_v45 = vadd.f32 %v513_v36, %v400_v42 }
 0x30e   :  { %v561_v49 = vsel %vm241_vm8, %v1981_v45, -inf }
 0x313   :  { %v516_v48 = vpop.f32.mrf.mxu0 }
 0x31a   :  { %v524_v50 = vpop.xlane.xlu2 %523 }
 0x31b   :  { %v570_v51 = vsub.f32 %v475_v6, %v524_v50  ;;  %v519_v58 = vpop.f32.mrf.mxu0 }
 0x31d   :  { %v586_v52 = vmul.f32 1.442695, %v570_v51 }
 0x31f   :  { %1419 = vpow2.f32 %v586_v52  ;;  %v401_v52 = vld [vmem:[%s2376_s17 + $0x70] sm:$0xff] }
 0x322   :  { %v527_v54 = vpop.xlane.xlu2 %526 }
 0x323   :  { %v571_v55 = vsub.f32 %v478_v14, %v527_v54  ;;  %v1993_v54 = vadd.f32 %v516_v48, %v401_v52 }
 0x325   :  { %v1917_v56 = vpop.eup %1419  ;;  %v588_v57 = vmul.f32 1.442695, %v571_v55 }
 0x326   :  { %v618_v59 = vsel %vm241_vm8, %v1917_v56, 0.0 }
 0x327   :  { %1421 = vpow2.f32 %v588_v57  ;;  %619 = vadd.xlane.f32.xlu2 %v618_v59  ;;  %v402_v57 = vld [vmem:[%s2376_s17 + $0x78] sm:$0xff] }
 0x32a   :  { %v530_v61 = vpop.xlane.xlu0 %529 }
 0x32b   :  { %v572_v62 = vsub.f32 %v481_v21, %v530_v61  ;;  %v2004_v61 = vadd.f32 %v519_v58, %v402_v57 }
 0x32d   :  { %v1928_v1 = vpop.eup %1421  ;;  %v590_v2 = vmul.f32 1.442695, %v572_v62  ;;  %v567_v62 = vsel %vm241_vm8, %v2004_v61, -inf }
 0x32e   :  { %v621_v4 = vsel %vm241_vm8, %v1928_v1, 0.0 }
 0x32f   :  { %1423 = vpow2.f32 %v590_v2  ;;  %622 = vadd.xlane.f32.xlu1 %v621_v4  ;;  %547 = vmax.xlane.f32.xlu2 %v546_v0 }
 0x332   :  { %v533_v6 = vpop.xlane.xlu1 %532 }
 0x333   :  { %v573_v7 = vsub.f32 %v484_v28, %v533_v6 }
 0x335   :  { %v1939_v9 = vpop.eup %1423  ;;  %v592_v11 = vmul.f32 1.442695, %v573_v7 }
 0x336   :  { %v624_v14 = vsel %vm241_vm8, %v1939_v9, 0.0 }
 0x337   :  { %1425 = vpow2.f32 %v592_v11  ;;  %625 = vadd.xlane.f32.xlu0 %v624_v14  ;;  %550 = vmax.xlane.f32.xlu1 %v549_v8 }
 0x33a   :  { %v536_v17 = vpop.xlane.xlu2 %535 }
 0x33b   :  { %v574_v18 = vsub.f32 %v487_v35, %v536_v17  ;;  %v1969_v35 = vadd.f32 %v510_v25, %v399_v33 }
 0x33d   :  { %v1950_v20 = vpop.eup %1425  ;;  %v594_v21 = vmul.f32 1.442695, %v574_v18 }
 0x33e   :  { %v627_v24 = vsel %vm241_vm8, %v1950_v20, 0.0 }
 0x33f   :  { %1427 = vpow2.f32 %v594_v21  ;;  %628 = vadd.xlane.f32.xlu2 %v627_v24  ;;  %553 = vmax.xlane.f32.xlu0 %v552_v19 }
 0x342   :  { %v539_v27 = vpop.xlane.xlu0 %538 }
 0x343   :  { %v575_v28 = vsub.f32 %v1899_v39, %v539_v27  ;;  %v558_v39 = vsel %vm241_vm8, %v1969_v35, -inf }
 0x345   :  { %v1962_v31 = vpop.eup %1427  ;;  %v596_v32 = vmul.f32 1.442695, %v575_v28 }
 0x346   :  { %v630_v34 = vsel %vm241_vm8, %v1962_v31, 0.0 }
 0x347   :  { %1429 = vpow2.f32 %v596_v32  ;;  %631 = vadd.xlane.f32.xlu1 %v630_v34  ;;  %556 = vmax.xlane.f32.xlu2 %v555_v29 }
 0x34a   :  { %v542_v37 = vpop.xlane.xlu1 %541 }
 0x34b   :  { %v576_v38 = vsub.f32 %v1906_v43, %v542_v37 }
 0x34d   :  { %v1974_v40 = vpop.eup %1429  ;;  %v598_v41 = vmul.f32 1.442695, %v576_v38 }
 0x34e   :  { %v633_v44 = vsel %vm241_vm8, %v1974_v40, 0.0 }
 0x34f   :  { %1431 = vpow2.f32 %v598_v41  ;;  %634 = vadd.xlane.f32.xlu0 %v633_v44  ;;  %559 = vmax.xlane.f32.xlu1 %v558_v39 }
 0x352   :  { %v545_v46 = vpop.xlane.xlu0 %544 }
 0x353   :  { %v577_v43 = vsub.f32 %v1913_v47, %v545_v46  ;;  %v564_v47 = vsel %vm241_vm8, %v1993_v54, -inf }
 0x355   :  { %v1986_v50 = vpop.eup %1431  ;;  %v600_v51 = vmul.f32 1.442695, %v577_v43 }
 0x356   :  { %v636_v53 = vsel %vm241_vm8, %v1986_v50, 0.0 }
 0x357   :  { %1433 = vpow2.f32 %v600_v51  ;;  %637 = vadd.xlane.f32.xlu2 %v636_v53  ;;  %562 = vmax.xlane.f32.xlu0 %v561_v49 }
 0x35d   :  { %v1997_v55 = vpop.eup %1433 }
 0x35e   :  { %v639_v59 = vsel %vm241_vm8, %v1997_v55, 0.0 }
 0x35f   :  { %640 = vadd.xlane.f32.xlu1 %v639_v59  ;;  %565 = vmax.xlane.f32.xlu2 %v564_v47 }
 0x367   :  { %568 = vmax.xlane.f32.xlu1 %v567_v62 }
 0x39a   :  { %v620_v63 = vpop.xlane.xlu2 %619 }
 0x39b   :  { %1435 = vrcp.f32 %v620_v63  ;;  %v677_v12 = vand.u32 2147483648, %v620_v63  ;;  %v675_v13 = vand.u32 2147483647, %v620_v63  ;;  %vm671_vm10 = vweird.f32 %v620_v63 }
 0x39d   :  { %v678_v18 = vor.u32 1.1754944e-38, %v677_v12  ;;  %vm676_vm12 = vcmp.eq.f32.partialorder %v675_v13, 8.507059e+37 }
 0x3a1   :  { %v1436_v0 = vpop.eup %1435 }
 0x3a2   :  { %v667_v2 = vmul.f32 %v1436_v0, %v620_v63  ;;  %v623_v3 = vpop.xlane.xlu1 %622  ;;  %v548_v4 = vpop.xlane.xlu2 %547  ;;  %vm672_vm9 = vweird.f32 %v1436_v0 }
 0x3a3   :  { %1437 = vrcp.f32 %v623_v3  ;;  %v578_v6 = vsub.f32 %v1924_v60, %v548_v4  ;;  %vm673_vm11 = vmor %vm671_vm10, %vm672_vm9  ;;  %v692_v34 = vand.u32 2147483648, %v623_v3  ;;  %v690_v37 = vand.u32 2147483647, %v623_v3 }
 0x3a4   :  { %v668_v7 = vsub.f32 1.0, %v667_v2  ;;  %vm686_vm14 = vweird.f32 %v623_v3 }
 0x3a5   :  { %v602_v8 = vmul.f32 1.442695, %v578_v6  ;;  %v693_v39 = vor.u32 1.1754944e-38, %v692_v34  ;;  %vm691_vm1 = vcmp.eq.f32.partialorder %v690_v37, 8.507059e+37 }
 0x3a6   :  { %v669_v11 = vmul.f32 %v1436_v0, %v668_v7 }
 0x3a7   :  { %1439 = vpow2.f32 %v602_v8 }
 0x3a8   :  { %v670_v14 = vadd.f32 %v1436_v0, %v669_v11 }
 0x3a9   :  { %v1438_v17 = vpop.eup %1437 }
 0x3aa   :  { %v682_v19 = vmul.f32 %v1438_v17, %v623_v3  ;;  %v626_v21 = vpop.xlane.xlu0 %625  ;;  %v551_v22 = vpop.xlane.xlu1 %550  ;;  %v674_v24 = vsel %vm673_vm11, %v1436_v0, %v670_v14  ;;  %vm687_vm13 = vweird.f32 %v1438_v17 }
 0x3ab   :  { %1441 = vrcp.f32 %v626_v21  ;;  %v579_v60 = vsub.f32 %v1935_v5, %v551_v22  ;;  %v679_v27 = vsel %vm676_vm12, %v678_v18, %v674_v24  ;;  %vm688_vm15 = vmor %vm686_vm14, %vm687_vm13  ;;  %v707_v47 = vand.u32 2147483648, %v626_v21 }
 0x3ac   :  { %v683_v25 = vsub.f32 1.0, %v682_v19  ;;  %v680_v32 = vmul.f32 %v1917_v56, %v679_v27  ;;  %v705_v58 = vand.u32 2147483647, %v626_v21  ;;  %vm701_vm3 = vweird.f32 %v626_v21 }
 0x3ad   :  { %v2010_v28 = vpop.eup %1439  ;;  %v604_v29 = vmul.f32 1.442695, %v579_v60  ;;  %v708_v62 = vor.u32 1.1754944e-38, %v707_v47 }
 0x3ae   :  { %v684_v33 = vmul.f32 %v1438_v17, %v683_v25  ;;  %v642_v36 = vsel %vm241_vm8, %v2010_v28, 0.0  ;;  %1381 = vmatmul.msk.f32.vlgmr.msrb.gmra.mxu1 %vm241_vm8, %v680_v32  ;;  %vm706_vm5 = vcmp.eq.f32.partialorder %v705_v58, 8.507059e+37 }
 0x3af   :  { %1443 = vpow2.f32 %v604_v29  ;;  %643 = vadd.xlane.f32.xlu0 %v642_v36 }
 0x3b0   :  { %v685_v5 = vadd.f32 %v1438_v17, %v684_v33 }
 0x3b1   :  { %v1442_v38 = vpop.eup %1441 }
 0x3b2   :  { %v697_v41 = vmul.f32 %v1442_v38, %v626_v21  ;;  %v629_v42 = vpop.xlane.xlu2 %628  ;;  %v554_v44 = vpop.xlane.xlu0 %553  ;;  %v689_v56 = vsel %vm688_vm15, %v1438_v17, %v685_v5  ;;  %vm702_vm2 = vweird.f32 %v1442_v38 }
 0x3b3   :  { %1445 = vrcp.f32 %v629_v42  ;;  %v580_v46 = vsub.f32 %v1946_v15, %v554_v44  ;;  %v694_v48 = vsel %vm691_vm1, %v693_v39, %v689_v56  ;;  %vm703_vm4 = vmor %vm701_vm3, %vm702_vm2  ;;  %v722_v13 = vand.u32 2147483648, %v629_v42 }
 0x3b4   :  { %v698_v43 = vsub.f32 1.0, %v697_v41  ;;  %v695_v52 = vmul.f32 %v1928_v1, %v694_v48  ;;  %v720_v17 = vand.u32 2147483647, %v629_v42  ;;  %vm716_vm7 = vweird.f32 %v629_v42 }
 0x3b5   :  { %v2017_v49 = vpop.eup %1443  ;;  %v606_v51 = vmul.f32 1.442695, %v580_v46  ;;  %v723_v19 = vor.u32 1.1754944e-38, %v722_v13 }
 0x3b6   :  { %v699_v53 = vmul.f32 %v1442_v38, %v698_v43  ;;  %v645_v57 = vsel %vm241_vm8, %v2017_v49, 0.0  ;;  %1382 = vmatmul.msk.f32.gmra.mxu1 %vm241_vm8, %v695_v52  ;;  %vm721_vm10 = vcmp.eq.f32.partialorder %v720_v17, 8.507059e+37 }
 0x3b7   :  { %1447 = vpow2.f32 %v606_v51  ;;  %646 = vadd.xlane.f32.xlu2 %v645_v57 }
 0x3b8   :  { %v700_v15 = vadd.f32 %v1442_v38, %v699_v53 }
 0x3b9   :  { %v1446_v59 = vpop.eup %1445 }
 0x3ba   :  { %v712_v63 = vmul.f32 %v1446_v59, %v629_v42  ;;  %v632_v0 = vpop.xlane.xlu1 %631  ;;  %v557_v2 = vpop.xlane.xlu2 %556  ;;  %v704_v1 = vsel %vm703_vm4, %v1442_v38, %v700_v15  ;;  %vm717_vm6 = vweird.f32 %v1446_v59 }
 0x3bb   :  { %1449 = vrcp.f32 %v632_v0  ;;  %v581_v3 = vsub.f32 %v1957_v26, %v557_v2  ;;  %v709_v6 = vsel %vm706_vm5, %v708_v62, %v704_v1  ;;  %vm718_vm9 = vmor %vm716_vm7, %vm717_vm6  ;;  %v737_v36 = vand.u32 2147483648, %v632_v0 }
 0x3bc   :  { %v713_v4 = vsub.f32 1.0, %v712_v63  ;;  %v710_v11 = vmul.f32 %v1939_v9, %v709_v6  ;;  %v735_v5 = vand.u32 2147483647, %v632_v0  ;;  %vm731_vm12 = vweird.f32 %v632_v0 }
 0x3bd   :  { %v2024_v7 = vpop.eup %1447  ;;  %v608_v8 = vmul.f32 1.442695, %v581_v3  ;;  %v738_v39 = vor.u32 1.1754944e-38, %v737_v36 }
 0x3be   :  { %v714_v12 = vmul.f32 %v1446_v59, %v713_v4  ;;  %v648_v14 = vsel %vm241_vm8, %v2024_v7, 0.0  ;;  %1383 = vmatmul.msk.f32.gmra.mxu1 %vm241_vm8, %v710_v11  ;;  %vm736_vm14 = vcmp.eq.f32.partialorder %v735_v5, 8.507059e+37 }
 0x3bf   :  { %1451 = vpow2.f32 %v608_v8  ;;  %649 = vadd.xlane.f32.xlu0 %v648_v14 }
 0x3c0   :  { %v715_v26 = vadd.f32 %v1446_v59, %v714_v12 }
 0x3c1   :  { %v1450_v18 = vpop.eup %1449 }
 0x3c2   :  { %v727_v21 = vmul.f32 %v1450_v18, %v632_v0  ;;  %v635_v22 = vpop.xlane.xlu0 %634  ;;  %v560_v24 = vpop.xlane.xlu1 %559  ;;  %v719_v9 = vsel %vm718_vm9, %v1446_v59, %v715_v26  ;;  %vm732_vm11 = vweird.f32 %v1450_v18 }
 0x3c3   :  { %1453 = vrcp.f32 %v635_v22  ;;  %v582_v60 = vsub.f32 %v1969_v35, %v560_v24  ;;  %v724_v27 = vsel %vm721_vm10, %v723_v19, %v719_v9  ;;  %vm733_vm13 = vmor %vm731_vm12, %vm732_vm11  ;;  %v752_v47 = vand.u32 2147483648, %v635_v22 }
 0x3c4   :  { %v728_v25 = vsub.f32 1.0, %v727_v21  ;;  %v725_v33 = vmul.f32 %v1950_v20, %v724_v27  ;;  %v750_v58 = vand.u32 2147483647, %v635_v22  ;;  %vm746_vm1 = vweird.f32 %v635_v22 }
 0x3c5   :  { %v2031_v29 = vpop.eup %1451  ;;  %v610_v32 = vmul.f32 1.442695, %v582_v60  ;;  %v753_v59 = vor.u32 1.1754944e-38, %v752_v47 }
 0x3c6   :  { %v729_v34 = vmul.f32 %v1450_v18, %v728_v25  ;;  %v651_v37 = vsel %vm241_vm8, %v2031_v29, 0.0  ;;  %1384 = vmatmul.msk.f32.gmra.mxu1 %vm241_vm8, %v725_v33  ;;  %vm751_vm3 = vcmp.eq.f32.partialorder %v750_v58, 8.507059e+37 }
 0x3c7   :  { %1455 = vpow2.f32 %v610_v32  ;;  %652 = vadd.xlane.f32.xlu1 %v651_v37 }
 0x3c8   :  { %v730_v35 = vadd.f32 %v1450_v18, %v729_v34 }
 0x3c9   :  { %v1454_v38 = vpop.eup %1453 }
 0x3ca   :  { %v742_v41 = vmul.f32 %v1454_v38, %v635_v22  ;;  %v638_v42 = vpop.xlane.xlu2 %637  ;;  %v563_v44 = vpop.xlane.xlu0 %562  ;;  %v734_v20 = vsel %vm733_vm13, %v1450_v18, %v730_v35  ;;  %vm747_vm15 = vweird.f32 %v1454_v38 }
 0x3cb   :  { %1457 = vrcp.f32 %v638_v42  ;;  %v583_v56 = vsub.f32 %v1981_v45, %v563_v44  ;;  %v739_v43 = vsel %vm736_vm14, %v738_v39, %v734_v20  ;;  %vm748_vm2 = vmor %vm746_vm1, %vm747_vm15  ;;  %v767_v6 = vand.u32 2147483648, %v638_v42 }
 0x3cc   :  { %v743_v46 = vsub.f32 1.0, %v742_v41  ;;  %v740_v52 = vmul.f32 %v1962_v31, %v739_v43  ;;  %v765_v14 = vand.u32 2147483647, %v638_v42  ;;  %vm761_vm5 = vweird.f32 %v638_v42 }
 0x3cd   :  { %v2038_v48 = vpop.eup %1455  ;;  %v612_v51 = vmul.f32 1.442695, %v583_v56  ;;  %v768_v26 = vor.u32 1.1754944e-38, %v767_v6 }
 0x3ce   :  { %v744_v53 = vmul.f32 %v1454_v38, %v743_v46  ;;  %v654_v57 = vsel %vm241_vm8, %v2038_v48, 0.0  ;;  %1385 = vmatmul.msk.f32.gmra.mxu1 %vm241_vm8, %v740_v52  ;;  %vm766_vm7 = vcmp.eq.f32.partialorder %v765_v14, 8.507059e+37 }
 0x3cf   :  { %1459 = vpow2.f32 %v612_v51  ;;  %655 = vadd.xlane.f32.xlu2 %v654_v57 }
 0x3d0   :  { %v745_v45 = vadd.f32 %v1454_v38, %v744_v53 }
 0x3d1   :  { %v1458_v15 = vpop.eup %1457 }
 0x3d2   :  { %v757_v62 = vmul.f32 %v1458_v15, %v638_v42  ;;  %v641_v63 = vpop.xlane.xlu1 %640  ;;  %v566_v0 = vpop.xlane.xlu2 %565  ;;  %v749_v31 = vsel %vm748_vm2, %v1454_v38, %v745_v45  ;;  %vm762_vm4 = vweird.f32 %v1458_v15 }
 0x3d3   :  { %1461 = vrcp.f32 %v641_v63  ;;  %v584_v2 = vsub.f32 %v1993_v54, %v566_v0  ;;  %v754_v3 = vsel %vm751_vm3, %v753_v59, %v749_v31  ;;  %vm763_vm6 = vmor %vm761_vm5, %vm762_vm4  ;;  %v782_v25 = vand.u32 2147483648, %v641_v63 }
 0x3d4   :  { %v758_v1 = vsub.f32 1.0, %v757_v62  ;;  %v755_v11 = vmul.f32 %v1974_v40, %v754_v3  ;;  %v780_v34 = vand.u32 2147483647, %v641_v63  ;;  %vm776_vm10 = vweird.f32 %v641_v63 }
 0x3d5   :  { %v2045_v4 = vpop.eup %1459  ;;  %v614_v8 = vmul.f32 1.442695, %v584_v2  ;;  %v783_v36 = vor.u32 1.1754944e-38, %v782_v25 }
 0x3d6   :  { %v759_v12 = vmul.f32 %v1458_v15, %v758_v1  ;;  %v657_v13 = vsel %vm241_vm8, %v2045_v4, 0.0  ;;  %1386 = vmatmul.msk.f32.gmra.mxu1 %vm241_vm8, %v755_v11  ;;  %vm781_vm12 = vcmp.eq.f32.partialorder %v780_v34, 8.507059e+37 }
 0x3d7   :  { %1463 = vpow2.f32 %v614_v8  ;;  %658 = vadd.xlane.f32.xlu0 %v657_v13 }
 0x3d8   :  { %v760_v54 = vadd.f32 %v1458_v15, %v759_v12 }
 0x3d9   :  { %v1462_v17 = vpop.eup %1461 }
 0x3da   :  { %v772_v18 = vmul.f32 %v1462_v17, %v641_v63  ;;  %v569_v19 = vpop.xlane.xlu1 %568  ;;  %v764_v21 = vsel %vm763_vm6, %v1458_v15, %v760_v54  ;;  %vm777_vm9 = vweird.f32 %v1462_v17 }
 0x3db   :  { %v585_v40 = vsub.f32 %v2004_v61, %v569_v19  ;;  %v769_v22 = vsel %vm766_vm7, %v768_v26, %v764_v21  ;;  %vm778_vm11 = vmor %vm776_vm10, %vm777_vm9 }
 0x3dc   :  { %v773_v24 = vsub.f32 1.0, %v772_v18  ;;  %v770_v9 = vmul.f32 %v1986_v50, %v769_v22 }
 0x3dd   :  { %v2053_v60 = vpop.eup %1463  ;;  %v616_v27 = vmul.f32 1.442695, %v585_v40 }
 0x3de   :  { %v774_v32 = vmul.f32 %v1462_v17, %v773_v24  ;;  %v660_v33 = vsel %vm241_vm8, %v2053_v60, 0.0  ;;  %1387 = vmatmul.msk.f32.gmra.mxu1 %vm241_vm8, %v770_v9 }
 0x3df   :  { %1465 = vpow2.f32 %v616_v27  ;;  %661 = vadd.xlane.f32.xlu1 %v660_v33 }
 0x3e0   :  { %v775_v61 = vadd.f32 %v1462_v17, %v774_v32 }
 0x3e2   :  { %v779_v37 = vsel %vm778_vm11, %v1462_v17, %v775_v61 }
 0x3e3   :  { %v784_v50 = vsel %vm781_vm12, %v783_v36, %v779_v37 }
 0x3e4   :  { %v785_v5 = vmul.f32 %v1997_v55, %v784_v50 }
 0x3e5   :  { %v2059_v35 = vpop.eup %1465 }
 0x3e6   :  { %v663_v38 = vsel %vm241_vm8, %v2059_v35, 0.0  ;;  %1388 = vmatmul.msk.f32.gmra.mxu1 %vm241_vm8, %v785_v5 }
 0x3e7   :  { %664 = vadd.xlane.f32.xlu2 %v663_v38 }
 0x422   :  { %v644_v39 = vpop.xlane.xlu0 %643 }
 0x423   :  { %1467 = vrcp.f32 %v644_v39  ;;  %v797_v56 = vand.u32 2147483648, %v644_v39  ;;  %v795_v43 = vand.u32 2147483647, %v644_v39  ;;  %vm791_vm14 = vweird.f32 %v644_v39 }
 0x425   :  { %v798_v52 = vor.u32 1.1754944e-38, %v797_v56  ;;  %vm796_vm1 = vcmp.eq.f32.partialorder %v795_v43, 8.507059e+37 }
 0x429   :  { %v1468_v41 = vpop.eup %1467 }
 0x42a   :  { %v787_v42 = vmul.f32 %v1468_v41, %v644_v39  ;;  %v647_v44 = vpop.xlane.xlu2 %646  ;;  %vm792_vm13 = vweird.f32 %v1468_v41 }
 0x42b   :  { %1469 = vrcp.f32 %v647_v44  ;;  %vm793_vm15 = vmor %vm791_vm14, %vm792_vm13  ;;  %v812_v59 = vand.u32 2147483648, %v647_v44  ;;  %v810_v63 = vand.u32 2147483647, %v647_v44  ;;  %vm806_vm3 = vweird.f32 %v647_v44 }
 0x42c   :  { %v788_v20 = vsub.f32 1.0, %v787_v42 }
 0x42d   :  { %v813_v2 = vor.u32 1.1754944e-38, %v812_v59  ;;  %vm811_vm5 = vcmp.eq.f32.partialorder %v810_v63, 8.507059e+37 }
 0x42e   :  { %v789_v46 = vmul.f32 %v1468_v41, %v788_v20 }
 0x430   :  { %v790_v55 = vadd.f32 %v1468_v41, %v789_v46 }
 0x431   :  { %v1470_v51 = vpop.eup %1469 }
 0x432   :  { %v802_v53 = vmul.f32 %v1470_v51, %v647_v44  ;;  %v650_v47 = vpop.xlane.xlu0 %649  ;;  %v794_v57 = vsel %vm793_vm15, %v1468_v41, %v790_v55  ;;  %vm807_vm2 = vweird.f32 %v1470_v51 }
 0x433   :  { %1471 = vrcp.f32 %v650_v47  ;;  %v799_v58 = vsel %vm796_vm1, %v798_v52, %v794_v57  ;;  %vm808_vm4 = vmor %vm806_vm3, %vm807_vm2  ;;  %v827_v12 = vand.u32 2147483648, %v650_v47  ;;  %v825_v14 = vand.u32 2147483647, %v650_v47 }
 0x434   :  { %v803_v45 = vsub.f32 1.0, %v802_v53  ;;  %v800_v15 = vmul.f32 %v2010_v28, %v799_v58  ;;  %vm821_vm7 = vweird.f32 %v650_v47 }
 0x435   :  { %v828_v26 = vor.u32 1.1754944e-38, %v827_v12  ;;  %vm826_vm10 = vcmp.eq.f32.partialorder %v825_v14, 8.507059e+37  ;;  %v2077_v14 = vpop.f32.mrf.mxu1 }
 0x436   :  { %v804_v62 = vmul.f32 %v1470_v51, %v803_v45  ;;  %1389 = vmatmul.msk.f32.gmra.mxu1 %vm241_vm8, %v800_v15 }
 0x438   :  { %v805_v0 = vadd.f32 %v1470_v51, %v804_v62 }
 0x439   :  { %v1472_v31 = vpop.eup %1471 }
 0x43a   :  { %v817_v1 = vmul.f32 %v1472_v31, %v650_v47  ;;  %v653_v3 = vpop.xlane.xlu1 %652  ;;  %v809_v6 = vsel %vm808_vm4, %v1470_v51, %v805_v0  ;;  %vm822_vm6 = vweird.f32 %v1472_v31 }
 0x43b   :  { %1473 = vrcp.f32 %v653_v3  ;;  %v814_v8 = vsel %vm811_vm5, %v813_v2, %v809_v6  ;;  %vm823_vm9 = vmor %vm821_vm7, %vm822_vm6  ;;  %v842_v24 = vand.u32 2147483648, %v653_v3  ;;  %v840_v25 = vand.u32 2147483647, %v653_v3 }
 0x43c   :  { %v818_v11 = vsub.f32 1.0, %v817_v1  ;;  %v815_v28 = vmul.f32 %v2017_v49, %v814_v8  ;;  %vm836_vm12 = vweird.f32 %v653_v3 }
 0x43d   :  { %v843_v33 = vor.u32 1.1754944e-38, %v842_v24  ;;  %vm841_vm14 = vcmp.eq.f32.partialorder %v840_v25, 8.507059e+37 }
 0x43e   :  { %v819_v13 = vmul.f32 %v1472_v31, %v818_v11  ;;  %1390 = vmatmul.msk.f32.gmra.mxu1 %vm241_vm8, %v815_v28 }
 0x440   :  { %v820_v54 = vadd.f32 %v1472_v31, %v819_v13 }
 0x441   :  { %v1474_v17 = vpop.eup %1473 }
 0x442   :  { %v832_v18 = vmul.f32 %v1474_v17, %v653_v3  ;;  %v656_v19 = vpop.xlane.xlu2 %655  ;;  %v824_v21 = vsel %vm823_vm9, %v1472_v31, %v820_v54  ;;  %vm837_vm11 = vweird.f32 %v1474_v17 }
 0x443   :  { %1475 = vrcp.f32 %v656_v19  ;;  %v829_v40 = vsel %vm826_vm10, %v828_v26, %v824_v21  ;;  %vm838_vm13 = vmor %vm836_vm12, %vm837_vm11  ;;  %v857_v5 = vand.u32 2147483648, %v656_v19  ;;  %v855_v39 = vand.u32 2147483647, %v656_v19 }
 0x444   :  { %v833_v22 = vsub.f32 1.0, %v832_v18  ;;  %v830_v49 = vmul.f32 %v2024_v7, %v829_v40  ;;  %vm851_vm1 = vweird.f32 %v656_v19 }
 0x445   :  { %v858_v44 = vor.u32 1.1754944e-38, %v857_v5  ;;  %vm856_vm3 = vcmp.eq.f32.partialorder %v855_v39, 8.507059e+37  ;;  %v1487_v39 = vld [vmem:[%s2375_s16 + $0x60] sm:$0xff] }
 0x446   :  { %v834_v9 = vmul.f32 %v1474_v17, %v833_v22  ;;  %1391 = vmatmul.msk.f32.gmra.mxu1 %vm241_vm8, %v830_v49 }
 0x448   :  { %v835_v27 = vadd.f32 %v1474_v17, %v834_v9 }
 0x449   :  { %v1476_v32 = vpop.eup %1475 }
 0x44a   :  { %v847_v34 = vmul.f32 %v1476_v32, %v656_v19  ;;  %v659_v61 = vpop.xlane.xlu0 %658  ;;  %v839_v36 = vsel %vm838_vm13, %v1474_v17, %v835_v27  ;;  %vm852_vm15 = vweird.f32 %v1476_v32 }
 0x44b   :  { %1477 = vrcp.f32 %v659_v61  ;;  %v844_v37 = vsel %vm841_vm14, %v843_v33, %v839_v36  ;;  %vm853_vm2 = vmor %vm851_vm1, %vm852_vm15  ;;  %v872_v51 = vand.u32 2147483648, %v659_v61  ;;  %v870_v53 = vand.u32 2147483647, %v659_v61 }
 0x44c   :  { %v848_v50 = vsub.f32 1.0, %v847_v34  ;;  %v845_v7 = vmul.f32 %v2031_v29, %v844_v37  ;;  %vm866_vm5 = vweird.f32 %v659_v61 }
 0x44d   :  { %v873_v58 = vor.u32 1.1754944e-38, %v872_v51  ;;  %vm871_vm7 = vcmp.eq.f32.partialorder %v870_v53, 8.507059e+37 }
 0x44e   :  { %v849_v38 = vmul.f32 %v1476_v32, %v848_v50  ;;  %1392 = vmatmul.msk.f32.gmra.mxu1 %vm241_vm8, %v845_v7 }
 0x450   :  { %v850_v41 = vadd.f32 %v1476_v32, %v849_v38 }
 0x451   :  { %v1478_v42 = vpop.eup %1477 }
 0x452   :  { %v862_v20 = vmul.f32 %v1478_v42, %v659_v61  ;;  %v662_v56 = vpop.xlane.xlu1 %661  ;;  %v854_v46 = vsel %vm853_vm2, %v1476_v32, %v850_v41  ;;  %vm867_vm4 = vweird.f32 %v1478_v42 }
 0x453   :  { %1479 = vrcp.f32 %v662_v56  ;;  %v859_v43 = vsel %vm856_vm3, %v858_v44, %v854_v46  ;;  %vm868_vm6 = vmor %vm866_vm5, %vm867_vm4  ;;  %v887_v0 = vand.u32 2147483648, %v662_v56  ;;  %v885_v2 = vand.u32 2147483647, %v662_v56 }
 0x454   :  { %v863_v55 = vsub.f32 1.0, %v862_v20  ;;  %v860_v29 = vmul.f32 %v2038_v48, %v859_v43  ;;  %vm881_vm10 = vweird.f32 %v662_v56  ;;  %v1492_v43 = vld [vmem:[%s2375_s16 + $0x38] sm:$0xff] }
 0x455   :  { %v888_v6 = vor.u32 1.1754944e-38, %v887_v0  ;;  %vm886_vm12 = vcmp.eq.f32.partialorder %v885_v2, 8.507059e+37  ;;  %v1067_v2 = vld [vmem:[%s2365_s6 + $0x38] sm:$0xff] }
 0x456   :  { %v864_v52 = vmul.f32 %v1478_v42, %v863_v55  ;;  %1393 = vmatmul.msk.f32.gmra.mxu1 %vm241_vm8, %v860_v29  ;;  %v1493_v29 = vld [vmem:[%s2375_s16 + $0x30] sm:$0xff] }
 0x458   :  { %v865_v47 = vadd.f32 %v1478_v42, %v864_v52  ;;  %v1494_v52 = vld [vmem:[%s2375_s16 + $0x28] sm:$0xff] }
 0x459   :  { %v1480_v57 = vpop.eup %1479 }
 0x45a   :  { %v877_v45 = vmul.f32 %v1480_v57, %v662_v56  ;;  %v665_v15 = vpop.xlane.xlu2 %664  ;;  %v869_v59 = vsel %vm868_vm6, %v1478_v42, %v865_v47  ;;  %vm882_vm9 = vweird.f32 %v1480_v57  ;;  %v1488_v42 = vld [vmem:[%s2375_s16 + $0x58] sm:$0xff]  ;;  %v1491_v56 = vld [vmem:[%s2375_s16 + $0x40] sm:$0xff] }
 0x45b   :  { %1481 = vrcp.f32 %v665_v15  ;;  %v874_v62 = vsel %vm871_vm7, %v873_v58, %v869_v59  ;;  %vm883_vm11 = vmor %vm881_vm10, %vm882_vm9  ;;  %v900_v17 = vand.u32 2147483647, %v665_v15  ;;  %vm896_vm14 = vweird.f32 %v665_v15  ;;  %v1495_v47 = vld [vmem:[%s2375_s16 + $0x20] sm:$0xff]  ;;  %v1496_v58 = vld [vmem:[%s2375_s16 + $0x18] sm:$0xff] }
 0x45c   :  { %v878_v63 = vsub.f32 1.0, %v877_v45  ;;  %v875_v48 = vmul.f32 %v2045_v4, %v874_v62  ;;  %v902_v4 = vand.u32 2147483648, %v665_v15  ;;  %v1498_v62 = vld [vmem:[%s2375_s16 + $0x8] sm:$0xff] }
 0x45d   :  { %vm901_vm1 = vcmp.eq.f32.partialorder %v900_v17, 8.507059e+37 }
 0x45e   :  { %v879_v31 = vmul.f32 %v1480_v57, %v878_v63  ;;  %1394 = vmatmul.msk.f32.gmra.mxu1 %vm241_vm8, %v875_v48  ;;  %v903_v18 = vor.u32 1.1754944e-38, %v902_v4  ;;  %v1499_v48 = vld [vmem:[%s2375_s16] sm:$0xff] }
 0x45f   :  { %v1021_v0 = vmul.f32 %v1499_v48, %v2077_v14 }
 0x460   :  { %v880_v1 = vadd.f32 %v1480_v57, %v879_v31  ;;  %v1019_v31 = vld [vmem:[%s2374_s15] sm:$0xff] }
 0x461   :  { %v1482_v3 = vpop.eup %1481 }
 0x462   :  { %v892_v8 = vmul.f32 %v1482_v3, %v665_v15  ;;  %v884_v11 = vsel %vm883_vm11, %v1480_v57, %v880_v1  ;;  %vm897_vm13 = vweird.f32 %v1482_v3  ;;  %v1497_v15 = vld [vmem:[%s2375_s16 + $0x10] sm:$0xff] }
 0x463   :  { %v889_v28 = vsel %vm886_vm12, %v888_v6, %v884_v11  ;;  %vm898_vm15 = vmor %vm896_vm14, %vm897_vm13  ;;  %v1066_v1 = vld [vmem:[%s2365_s6 + $0x30] sm:$0xff]  ;;  %v1064_v6 = vld [vmem:[%s2365_s6 + $0x20] sm:$0xff] }
 0x464   :  { %v893_v12 = vsub.f32 1.0, %v892_v8  ;;  %v890_v13 = vmul.f32 %v2053_v60, %v889_v28  ;;  %v974_v60 = vpop.f32.mrf.mxu1  ;;  %v1020_v8 = vld [vmem:[%s2374_s15 + $0x8] sm:$0xff]  ;;  %v1063_v11 = vld [vmem:[%s2365_s6 + $0x18] sm:$0xff]  ;;  %v1062_v28 = vld [vmem:[%s2365_s6 + $0x10] sm:$0xff] }
 0x465   :  { %v1022_v63 = vmul.f32 %v1498_v62, %v974_v60 }
 0x466   :  { %v894_v54 = vmul.f32 %v1482_v3, %v893_v12  ;;  %1395 = vmatmul.msk.f32.gmra.mxu1 %vm241_vm8, %v890_v13  ;;  %v1061_v12 = vld [vmem:[%s2365_s6 + $0x8] sm:$0xff]  ;;  %v1060_v13 = vld [vmem:[%s2365_s6] sm:$0xff] }
 0x468   :  { %v895_v26 = vadd.f32 %v1482_v3, %v894_v54  ;;  %v1409_v54 = vld [vmem:[%s2366_s7] ss:$0 sm:$0xff] }
 0x46a   :  { %v899_v19 = vsel %vm898_vm15, %v1482_v3, %v895_v26  ;;  %v1065_v3 = vld [vmem:[%s2365_s6 + $0x28] sm:$0xff]  ;;  %s1327_s6 = sshll.u32 %s1529_s24, 4  ;;  %s1328_s6 = int_to_ptr.vmem [resolvable:$true] %s1327_s6 }
 0x46b   :  { %v904_v21 = vsel %vm901_vm1, %v903_v18, %v899_v19  ;;  %v1500_v18 = vld [vmem:[%s2382_s29] sm:$0xff] }
 0x46c   :  { %v905_v40 = vmul.f32 %v2059_v35, %v904_v21  ;;  %v977_v22 = vpop.f32.mrf.mxu1 }
 0x46d   :  { %v1023_v59 = vmul.f32 %v1497_v15, %v977_v22  ;;  %v1501_v22 = vld [vmem:[%s2382_s29 + $0x8] sm:$0xff]  ;;  %s1329_s29 = sshll.u32 %s2377_s18, 4  ;;  %s1330_s29 = int_to_ptr.hbm [resolvable:$true] %s1329_s29 }
 0x46e   :  { %1396 = vmatmul.msk.f32.gmra.mxu1 %vm241_vm8, %v905_v40 }
 0x474   :  { %v980_v49 = vpop.f32.mrf.mxu1 }
 0x475   :  { %v1024_v45 = vmul.f32 %v1496_v58, %v980_v49 }
 0x47c   :  { %v983_v24 = vpop.f32.mrf.mxu1 }
 0x47d   :  { %v1025_v57 = vmul.f32 %v1495_v47, %v983_v24  ;;  %v1160_v47 = vld [vmem:[%s2369_s10 + $0x8] sm:$0xff] }
 0x484   :  { %v986_v9 = vpop.f32.mrf.mxu1 }
 0x485   :  { %v1026_v53 = vmul.f32 %v1494_v52, %v986_v9  ;;  %v1162_v52 = vld [vmem:[%s2369_s10 + $0x18] sm:$0xff] }
 0x48c   :  { %v989_v25 = vpop.f32.mrf.mxu1 }
 0x48d   :  { %v1027_v51 = vmul.f32 %v1493_v29, %v989_v25  ;;  %v1164_v29 = vld [vmem:[%s2369_s10 + $0x28] sm:$0xff] }
 0x494   :  { %v992_v27 = vpop.f32.mrf.mxu1 }
 0x495   :  { %v1028_v55 = vmul.f32 %v1492_v43, %v992_v27 }
 0x4b3   :  { %v995_v32 = vpop.f32.mrf.mxu1 }
 0x4b4   :  { %v1029_v46 = vmul.f32 %v1491_v56, %v995_v32 }
 0x4bb   :  { %v998_v33 = vpop.f32.mrf.mxu1 }
 0x4c3   :  { %v1001_v34 = vpop.f32.mrf.mxu1 }
 0x4cb   :  { %v1004_v61 = vpop.f32.mrf.mxu1 }
 0x4cc   :  { %v1032_v44 = vmul.f32 %v1488_v42, %v1004_v61  ;;  %v1161_v42 = vld [vmem:[%s2369_s10 + $0x10] sm:$0xff] }
 0x4d3   :  { %v1007_v36 = vpop.f32.mrf.mxu1 }
 0x4d4   :  { %v1033_v41 = vmul.f32 %v1487_v39, %v1007_v36  ;;  %v1165_v39 = vld [vmem:[%s2369_s10 + $0x30] sm:$0xff] }
 0x4db   :  { %v1010_v37 = vpop.f32.mrf.mxu1 }
 0x4dc   :  { %v1034_v38 = vmul.f32 %v1010_v37, %v1866_v16  ;;  %v1490_v16 = vld [vmem:[%s2375_s16 + $0x48] sm:$0xff] }
 0x4dd   :  { %v1030_v20 = vmul.f32 %v1490_v16, %v998_v33 }
 0x4e3   :  { %v1013_v50 = vpop.f32.mrf.mxu1 }
 0x4e4   :  { %v1035_v35 = vmul.f32 %v1013_v50, %v1877_v23  ;;  %v1489_v23 = vld [vmem:[%s2375_s16 + $0x50] sm:$0xff] }
 0x4eb   :  { %v1016_v7 = vpop.f32.mrf.mxu1 }
 0x4ec   :  { %v1036_v5 = vmul.f32 %v1016_v7, %v1888_v30  ;;  %v1031_v30 = vmul.f32 %v1489_v23, %v1001_v34  ;;  %v1173_v7 = vld [vmem:[%s2369_s10 + $0x70] sm:$0xff]  ;;  %v1174_v23 = vld [vmem:[%s2369_s10 + $0x78] sm:$0xff] }
 0x4ee   :  { %1037 = vmatpush.msrb.mxu2 %v1036_v5  ;;  %v1171_v5 = vld [vmem:[%s2369_s10 + $0x60] sm:$0xff] }
 0x4f0   :  { %1038 = vmatpush.msrb.mxu2 %v1035_v35  ;;  %v1169_v35 = vld [vmem:[%s2369_s10 + $0x50] sm:$0xff] }
 0x4f2   :  { %1039 = vmatpush.msrb.mxu2 %v1034_v38  ;;  %v1167_v38 = vld [vmem:[%s2369_s10 + $0x40] sm:$0xff] }
 0x4f4   :  { %1040 = vmatpush.msrb.mxu2 %v1033_v41  ;;  %v1163_v41 = vld [vmem:[%s2369_s10 + $0x20] sm:$0xff] }
 0x4f6   :  { %1041 = vmatpush.msrb.mxu2 %v1032_v44  ;;  %v1159_v44 = vld [vmem:[%s2369_s10] sm:$0xff] }
 0x4f8   :  { %1042 = vmatpush.msrb.mxu2 %v1031_v30  ;;  %v1172_v30 = vld [vmem:[%s2369_s10 + $0x68] sm:$0xff] }
 0x4fa   :  { %1043 = vmatpush.msrb.mxu2 %v1030_v20  ;;  %v1170_v20 = vld [vmem:[%s2369_s10 + $0x58] sm:$0xff] }
 0x4fc   :  { %1044 = vmatpush.msrb.mxu2 %v1029_v46  ;;  %v1168_v46 = vld [vmem:[%s2369_s10 + $0x48] sm:$0xff] }
 0x4fe   :  { %1045 = vmatpush.msrb.mxu2 %v1028_v55  ;;  %v1166_v55 = vld [vmem:[%s2369_s10 + $0x38] sm:$0xff] }
 0x500   :  { %1046 = vmatpush.msrb.mxu2 %v1027_v51 }
 0x502   :  { %1047 = vmatpush.msrb.mxu2 %v1026_v53 }
 0x504   :  { %1048 = vmatpush.msrb.mxu2 %v1025_v57 }
 0x506   :  { %1049 = vmatpush.msrb.mxu2 %v1024_v45 }
 0x508   :  { %1050 = vmatpush.msrb.mxu2 %v1023_v59 }
 0x50a   :  { %1051 = vmatpush.msrb.mxu2 %v1022_v63 }
 0x50c   :  { %1052 = vmatpush.msrb.mxu2 %v1021_v0 }
 0x50d   :  { %1053 = vmatmul.f32.vlgmr.msrb.gmra.mxu2 %v1019_v31  ;;  %v1268_v31 = vld [vmem:[%s2371_s12 + $0xf8] sm:$0xff] }
 0x50e   :  { %1086 = vmatpush.msra.mxu2 %v1067_v2  ;;  %v1267_v2 = vld [vmem:[%s2371_s12 + $0xf0] sm:$0xff]  ;;  %1296 = vmatpush.msrb.mxu3 %v1268_v31 }
 0x510   :  { %1087 = vmatpush.msra.mxu2 %v1066_v1  ;;  %1297 = vmatpush.msrb.mxu3 %v1267_v2 }
 0x512   :  { %1088 = vmatpush.msra.mxu2 %v1065_v3 }
 0x514   :  { %1089 = vmatpush.msra.mxu2 %v1064_v6 }
 0x515   :  { %1056 = vmatmul.f32.gmra.mxu2 %v1020_v8  ;;  %v1411_v8 = vld [vmem:[%s2368_s9] ss:$0 sm:$0xff] }
 0x516   :  { %1090 = vmatpush.msra.mxu2 %v1063_v11  ;;  %v1266_v11 = vld [vmem:[%s2371_s12 + $0xe8] sm:$0xff] }
 0x517   :  { %1298 = vmatpush.msrb.mxu3 %v1266_v11 }
 0x518   :  { %1091 = vmatpush.msra.mxu2 %v1062_v28 }
 0x51a   :  { %1092 = vmatpush.msra.mxu2 %v1061_v12 }
 0x51c   :  { %1093 = vmatpush.msra.mxu2 %v1060_v13  ;;  %v1265_v13 = vld [vmem:[%s2371_s12 + $0xe0] sm:$0xff] }
 0x51d   :  { %1299 = vmatpush.msrb.mxu3 %v1265_v13 }
 0x51e   :  { %1195 = vmatpush.msrb.mxu2 %v1173_v7  ;;  %v1257_v7 = vld [vmem:[%s2371_s12 + $0xa0] sm:$0xff] }
 0x520   :  { %1196 = vmatpush.msrb.mxu2 %v1171_v5  ;;  %v1245_v5 = vld [vmem:[%s2371_s12 + $0x40] sm:$0xff] }
 0x522   :  { %1197 = vmatpush.msrb.mxu2 %v1169_v35  ;;  %v1256_v35 = vld [vmem:[%s2371_s12 + $0x98] sm:$0xff] }
 0x524   :  { %1198 = vmatpush.msrb.mxu2 %v1167_v38  ;;  %v1244_v38 = vld [vmem:[%s2371_s12 + $0x38] sm:$0xff] }
 0x526   :  { %1199 = vmatpush.msrb.mxu2 %v1165_v39  ;;  %v1243_v39 = vld [vmem:[%s2371_s12 + $0x30] sm:$0xff] }
 0x528   :  { %1200 = vmatpush.msrb.mxu2 %v1163_v41  ;;  %v1255_v41 = vld [vmem:[%s2371_s12 + $0x90] sm:$0xff] }
 0x52a   :  { %1201 = vmatpush.msrb.mxu2 %v1161_v42  ;;  %v1242_v42 = vld [vmem:[%s2371_s12 + $0x28] sm:$0xff] }
 0x52c   :  { %1202 = vmatpush.msrb.mxu2 %v1159_v44  ;;  %v1241_v44 = vld [vmem:[%s2371_s12 + $0x20] sm:$0xff] }
 0x590   :  { %v1054_v14 = vpop.f32.mrf.mxu2 }
 0x591   :  { %1397 = vmatmul.msk.f32.vlgmr.msra.gmra.mxu2 %vm62_vm0, %v1054_v14 }
 0x592   :  { %1218 = vmatpush.msra.mxu2 %v1174_v23  ;;  %v1240_v23 = vld [vmem:[%s2371_s12 + $0x18] sm:$0xff] }
 0x594   :  { %1219 = vmatpush.msra.mxu2 %v1172_v30  ;;  %v1239_v30 = vld [vmem:[%s2371_s12 + $0x10] sm:$0xff] }
 0x596   :  { %1220 = vmatpush.msra.mxu2 %v1170_v20  ;;  %v1237_v20 = vld [vmem:[%s2371_s12] sm:$0xff] }
 0x598   :  { %v1057_v4 = vpop.f32.mrf.mxu2  ;;  %1221 = vmatpush.msra.mxu2 %v1168_v46  ;;  %v1253_v46 = vld [vmem:[%s2371_s12 + $0x80] sm:$0xff] }
 0x599   :  { %1398 = vmatmul.msk.f32.gmra.mxu2 %vm62_vm0, %v1057_v4 }
 0x59a   :  { %1222 = vmatpush.msra.mxu2 %v1166_v55 }
 0x59c   :  { %1223 = vmatpush.msra.mxu2 %v1164_v29 }
 0x59e   :  { %1224 = vmatpush.msra.mxu2 %v1162_v52 }
 0x5a0   :  { %1225 = vmatpush.msra.mxu2 %v1160_v47 }
 0x614   :  { %v1095_v17 = vpop.f32.mrf.mxu2 }
 0x615   :  { %v1096_v26 = vadd.f32 %v1409_v54, %v1095_v17  ;;  %v1252_v17 = vld [vmem:[%s2371_s12 + $0x78] sm:$0xff] }
 0x617   :  { %v2163_v19 = vadd.f32 %v1500_v18, %v1096_v26  ;;  %v1263_v18 = vld [vmem:[%s2371_s12 + $0xd0] sm:$0xff] }
 0x619   :  { %v1103_v21 = vsel %vm62_vm0, %v2163_v19, 0.0 }
 0x61a   :  { %1104 = vadd.xlane.f32.xlu0 %v1103_v21  ;;  %v1251_v21 = vld [vmem:[%s2371_s12 + $0x70] sm:$0xff] }
 0x61c   :  { %v1098_v40 = vpop.f32.mrf.mxu2 }
 0x61d   :  { %v1099_v60 = vadd.f32 %v1409_v54, %v1098_v40  ;;  %v1264_v54 = vld [vmem:[%s2371_s12 + $0xd8] sm:$0xff] }
 0x61e   :  { %1300 = vmatpush.msrb.mxu3 %v1264_v54 }
 0x61f   :  { %v2170_v49 = vadd.f32 %v1501_v22, %v1099_v60  ;;  %v1262_v22 = vld [vmem:[%s2371_s12 + $0xc8] sm:$0xff] }
 0x620   :  { %1301 = vmatpush.msrb.mxu3 %v1263_v18 }
 0x621   :  { %v1106_v24 = vsel %vm62_vm0, %v2170_v49, 0.0 }
 0x622   :  { %1107 = vadd.xlane.f32.xlu1 %v1106_v24  ;;  %v1250_v24 = vld [vmem:[%s2371_s12 + $0x68] sm:$0xff]  ;;  %1302 = vmatpush.msrb.mxu3 %v1262_v22 }
 0x68d   :  { %v1105_v9 = vpop.xlane.xlu0 %1104 }
 0x68e   :  { %v1109_v25 = vmul.f32 %v1105_v9, %v1635_v10 }
 0x690   :  { %v2176_v27 = vsub.f32 %v2163_v19, %v1109_v25  ;;  %v1261_v25 = vld [vmem:[%s2371_s12 + $0xc0] sm:$0xff] }
 0x691   :  { %1303 = vmatpush.msrb.mxu3 %v1261_v25 }
 0x692   :  { %v1113_v32 = vmul.f32 %v2176_v27, %v2176_v27 }
 0x694   :  { %v1115_v33 = vsel %vm62_vm0, %v1113_v32, 0.0 }
 0x695   :  { %v1108_v34 = vpop.xlane.xlu1 %1107  ;;  %1116 = vadd.xlane.f32.xlu2 %v1115_v33  ;;  %v1260_v33 = vld [vmem:[%s2371_s12 + $0xb8] sm:$0xff] }
 0x696   :  { %v1110_v61 = vmul.f32 %v1108_v34, %v1635_v10  ;;  %v1248_v34 = vld [vmem:[%s2371_s12 + $0x58] sm:$0xff]  ;;  %1304 = vmatpush.msrb.mxu3 %v1260_v33 }
 0x698   :  { %v2183_v36 = vsub.f32 %v2170_v49, %v1110_v61  ;;  %v1259_v61 = vld [vmem:[%s2371_s12 + $0xb0] sm:$0xff] }
 0x699   :  { %1305 = vmatpush.msrb.mxu3 %v1259_v61 }
 0x69a   :  { %v1114_v37 = vmul.f32 %v2183_v36, %v2183_v36 }
 0x69c   :  { %v1118_v50 = vsel %vm62_vm0, %v1114_v37, 0.0  ;;  %v1258_v37 = vld [vmem:[%s2371_s12 + $0xa8] sm:$0xff] }
 0x69d   :  { %1119 = vadd.xlane.f32.xlu0 %v1118_v50  ;;  %v1246_v50 = vld [vmem:[%s2371_s12 + $0x48] sm:$0xff]  ;;  %1306 = vmatpush.msrb.mxu3 %v1258_v37 }
 0x69f   :  { %1307 = vmatpush.msrb.mxu3 %v1257_v7 }
 0x6a1   :  { %1308 = vmatpush.msrb.mxu3 %v1256_v35 }
 0x6a3   :  { %1309 = vmatpush.msrb.mxu3 %v1255_v41 }
 0x708   :  { %v1117_v16 = vpop.xlane.xlu2 %1116 }
 0x709   :  { %v1121_v56 = vmul.f32 %v1117_v16, %v1635_v10  ;;  %v1238_v16 = vld [vmem:[%s2371_s12 + $0x8] sm:$0xff] }
 0x70b   :  { %v1123_v43 = vadd.f32 1e-05, %v1121_v56  ;;  %v1254_v56 = vld [vmem:[%s2371_s12 + $0x88] sm:$0xff] }
 0x70c   :  { %1310 = vmatpush.msrb.mxu3 %v1254_v56 }
 0x70d   :  { %1483 = vrsqrt.f32 %v1123_v43  ;;  %vm1131_vm2 = vweird.f32 %v1123_v43 }
 0x70e   :  { %1311 = vmatpush.msrb.mxu3 %v1253_v46 }
 0x710   :  { %v1120_v51 = vpop.xlane.xlu0 %1119 }
 0x711   :  { %v1122_v53 = vmul.f32 %v1120_v51, %v1635_v10  ;;  %v1410_v10 = vld [vmem:[%s2367_s8] ss:$0 sm:$0xff] }
 0x713   :  { %v1484_v57 = vpop.eup %1483  ;;  %v1124_v58 = vadd.f32 1e-05, %v1122_v53 }
 0x714   :  { %v1126_v45 = vmul.f32 %v1484_v57, %v1123_v43  ;;  %vm1132_vm8 = vweird.f32 %v1484_v57  ;;  %v1175_v43 = vld [vmem:[%s2370_s11] sm:$0x3] }
 0x715   :  { %1485 = vrsqrt.f32 %v1124_v58  ;;  %vm1133_vm3 = vmor %vm1131_vm2, %vm1132_vm8  ;;  %vm1141_vm5 = vweird.f32 %v1124_v58  ;;  %v1177_v55 = vperm.slane %v1175_v43, 0 }
 0x716   :  { %v1127_v15 = vmul.f32 %v1484_v57, %v1126_v45 }
 0x718   :  { %v1128_v59 = vmul.f32 0.5, %v1127_v15 }
 0x71a   :  { %v1129_v62 = vsub.f32 1.5, %v1128_v59 }
 0x71b   :  { %v1486_v63 = vpop.eup %1485 }
 0x71c   :  { %v1130_v48 = vmul.f32 %v1484_v57, %v1129_v62  ;;  %v1136_v0 = vmul.f32 %v1486_v63, %v1124_v58  ;;  %vm1142_vm4 = vweird.f32 %v1486_v63  ;;  %v1178_v58 = vperm.slane %v1175_v43, 1 }
 0x71d   :  { %vm1143_vm6 = vmor %vm1141_vm5, %vm1142_vm4 }
 0x71e   :  { %v1134_v1 = vsel %vm1133_vm3, %v1484_v57, %v1130_v48  ;;  %v1137_v3 = vmul.f32 %v1486_v63, %v1136_v0  ;;  %v1412_v0 = vld [vmem:[%s2372_s13] ss:$0 sm:$0xff]  ;;  %s1530_s13 = smov 128  }
 0x71f   :  { %v1145_v6 = vmul.f32 %v1134_v1, %v2176_v27  ;;  %v1249_v27 = vld [vmem:[%s2371_s12 + $0x60] sm:$0xff] }
 0x720   :  { %v1138_v28 = vmul.f32 0.5, %v1137_v3 }
 0x721   :  { %v1151_v12 = vmul.f32 %v1410_v10, %v1145_v6 }
 0x722   :  { %v1139_v14 = vsub.f32 1.5, %v1138_v28 }
 0x723   :  { %v1157_v4 = vadd.f32 %v1411_v8, %v1151_v12 }
 0x724   :  { %v1140_v26 = vmul.f32 %v1486_v63, %v1139_v14 }
 0x725   :  { %1399 = vmatmul.msk.f32.vlgmr.msrb.gmra.mxu2 %vm62_vm0, %v1157_v4 }
 0x726   :  { %v1144_v40 = vsel %vm1143_vm6, %v1486_v63, %v1140_v26  ;;  %1273 = vmatpush.msrb.mxu2 %v1252_v17 }
 0x727   :  { %v1146_v60 = vmul.f32 %v1144_v40, %v2183_v36  ;;  %v1247_v36 = vld [vmem:[%s2371_s12 + $0x50] sm:$0xff] }
 0x728   :  { %1274 = vmatpush.msrb.mxu2 %v1251_v21 }
 0x729   :  { %v1152_v9 = vmul.f32 %v1410_v10, %v1146_v60 }
 0x72a   :  { %1275 = vmatpush.msrb.mxu2 %v1250_v24 }
 0x72b   :  { %v1158_v32 = vadd.f32 %v1411_v8, %v1152_v9 }
 0x72c   :  { %1276 = vmatpush.msrb.mxu2 %v1249_v27 }
 0x72d   :  { %1400 = vmatmul.msk.f32.gmra.mxu2 %vm62_vm0, %v1158_v32 }
 0x72e   :  { %1277 = vmatpush.msrb.mxu2 %v1248_v34 }
 0x730   :  { %1278 = vmatpush.msrb.mxu2 %v1247_v36 }
 0x732   :  { %1279 = vmatpush.msrb.mxu2 %v1246_v50 }
 0x734   :  { %1280 = vmatpush.msrb.mxu2 %v1245_v5 }
 0x735   :  { %1401 = vmatmul.msk.f32.vlgmr.msra.gmra.mxu2 %vm62_vm0, %v1157_v4 }
 0x736   :  { %1281 = vmatpush.msrb.mxu2 %v1244_v38 }
 0x738   :  { %1282 = vmatpush.msrb.mxu2 %v1243_v39 }
 0x73a   :  { %1283 = vmatpush.msrb.mxu2 %v1242_v42 }
 0x73c   :  { %1284 = vmatpush.msrb.mxu2 %v1241_v44 }
 0x73d   :  { %1402 = vmatmul.msk.f32.gmra.mxu2 %vm62_vm0, %v1158_v32 }
 0x73e   :  { %1285 = vmatpush.msrb.mxu2 %v1240_v23 }
 0x740   :  { %1286 = vmatpush.msrb.mxu2 %v1239_v30 }
 0x742   :  { %1287 = vmatpush.msrb.mxu2 %v1238_v16 }
 0x744   :  { %1288 = vmatpush.msrb.mxu2 %v1237_v20 }
 0x7a8   :  { %v1204_v29 = vpop.f32.mrf.mxu2 }
 0x7a9   :  { %v1205_v51 = vadd.f32 %v1204_v29, %v1177_v55 }
 0x7ab   :  { %v1233_v52 = vmax.f32 %v1205_v51, 0.0 }
 0x7ad   :  { %1289 = vmatmul.f32.vlgmr.msrb.gmra.mxu2 %v1233_v52 }
 0x7b0   :  { %v1207_v53 = vpop.f32.mrf.mxu2 }
 0x7b1   :  { %v1208_v47 = vadd.f32 %v1207_v53, %v1177_v55 }
 0x7b3   :  { %v1235_v57 = vmax.f32 %v1208_v47, 0.0 }
 0x7b5   :  { %1292 = vmatmul.f32.gmra.mxu2 %v1235_v57 }
 0x7b8   :  { %v1227_v45 = vpop.f32.mrf.mxu2 }
 0x7b9   :  { %v1228_v15 = vadd.f32 %v1227_v45, %v1178_v58 }
 0x7bb   :  { %v1234_v59 = vmax.f32 %v1228_v15, 0.0 }
 0x7bd   :  { %1312 = vmatmul.f32.vlgmr.msrb.gmra.mxu3 %v1234_v59 }
 0x7c0   :  { %v1230_v62 = vpop.f32.mrf.mxu2 }
 0x7c1   :  { %v1231_v63 = vadd.f32 %v1230_v62, %v1178_v58 }
 0x7c3   :  { %v1236_v10 = vmax.f32 %v1231_v63, 0.0 }
 0x7c5   :  { %1315 = vmatmul.f32.gmra.mxu3 %v1236_v10 }
 0x830   :  { %v1290_v48 = vpop.f32.mrf.mxu2 }
 0x831   :  { %v1291_v31 = vadd.f32 %v1412_v0, %v1290_v48 }
 0x838   :  { %v1293_v6 = vpop.f32.mrf.mxu2 }
 0x839   :  { %v1294_v8 = vadd.f32 %v1412_v0, %v1293_v6 }
 0x840   :  { %v1313_v2 = vpop.f32.mrf.mxu3 }
 0x841   :  { %v1314_v1 = vadd.f32 %v1313_v2, %v1291_v31 }
 0x843   :  { %v1319_v3 = vadd.f32 %v1314_v1, %v2163_v19 }
 0x845   :  { %1321 = vst.msk [vmem:[#allocation2] sm:$0xff] %vm62_vm0, %v1319_v3 }
 0x848   :  { %v1316_v11 = vpop.f32.mrf.mxu3 }
 0x849   :  { %v1317_v28 = vadd.f32 %v1316_v11, %v1294_v8 }
 0x84b   :  { %v1320_v12 = vadd.f32 %v1317_v28, %v2170_v49 }
 0x84d   :  { %1322 = vst.msk [vmem:[#allocation2 + $0x8] sm:$0xff] %vm62_vm0, %v1320_v12 }
 0x84e   :  { %1335 = dma.vmem_to_hbm [thread:$0]  %s1328_s6, 256, %s1330_s29, [#allocation3], %s1530_s13, %s1530_s13, %s1531_s26  }
 0x84f   :  { %1526 = dma.done.wait [#allocation3], 256  }
 0x850   :  { %1527 = vsyncadd [#allocation3], 4294967040 }
 0x851   :  { %1340 = vsyncpa [#allocation3], 1 }

</bundles_post_ra>
